<compile_context>
chip_gen: v5e
topology: v5e:2x2
jax: 0.10.0
libtpu: 0.0.40
codegen_flags: <defaults>
</compile_context>

<pallas_src>
import jax
import jax.numpy as jnp
from jax import lax
from jax.experimental import pallas as pl
from jax.experimental.pallas import tpu as pltpu

RRELU_EVAL_SLOPE = (1.0 / 8.0 + 1.0 / 3.0) / 2.0  # F.rrelu eval-mode slope


# ---------------------------------------------------------------------------
# Fused kernel: rgcn1 -> rgcn2 -> gather(node_ids) -> cos time emb -> concat
# ---------------------------------------------------------------------------
def fused_rgcn_seq_kernel(ids_ref,                                   # SMEM (BL,) i32
                          ent_ref, rel_ref, adj_ref, relcnt_ref, deg_ref,
                          w1_ref, w2_ref, tw_ref, tb_ref, time_ref,  # VMEM
                          out_ref,                                   # VMEM (BL, 128)
                          h_scr, g_scr):                             # VMEM scratch
    N, H = ent_ref.shape
    T = tw_ref.shape[1]
    BL = g_scr.shape[0]

    # Shared degree norm 1/max(in_deg, 1): EUP approx reciprocal (free slot).
    norm = pl.reciprocal(jnp.maximum(deg_ref[...], 1.0), approx=True)     # (N,1) f32

    # bf16 MXU operands, f32 accumulation (counts 0..255 are exact in bf16).
    adj_b = adj_ref[...].astype(jnp.bfloat16)                             # (N,N)
    relcnt_b = relcnt_ref[...].astype(jnp.bfloat16)                       # (N,2R)
    rel_b = rel_ref[...].astype(jnp.bfloat16)                             # (2R,H)

    # Relation contribution to the dst scatter-sum is identical for both layers.
    rel_msg = jnp.dot(relcnt_b, rel_b, preferred_element_type=jnp.float32)  # (N,H)

    def layer(h_f32, w_ref):
        # scatter-sum raw messages first, then one fused K=2H matmul [Wn; Wloop]
        agg = jnp.dot(adj_b, h_f32.astype(jnp.bfloat16),
                      preferred_element_type=jnp.float32) + rel_msg       # (N,H)
        x = jnp.concatenate([agg * norm, h_f32], axis=-1)                 # (N,2H)
        pre = jnp.dot(x.astype(jnp.bfloat16), w_ref[...].astype(jnp.bfloat16),
                      preferred_element_type=jnp.float32)                 # (N,H)
        # F.rrelu eval mode == deterministic leaky relu, f32 on the VPU
        return jnp.where(pre >= 0.0, pre, RRELU_EVAL_SLOPE * pre)

    h1 = layer(ent_ref[...], w1_ref)
    h2 = layer(h1, w2_ref)
    h_scr[...] = h2                       # final node features stay in VMEM

    # Time embedding for all batch*seq positions at once (EUP cos), f32.
    te = jnp.cos(time_ref[...] * tw_ref[...] + tb_ref[...])               # (BL,T)

    # Index-based gather h2[node_ids]; padding id == N -> zero padding row.
    def gather_row(b, carry):
        nid = ids_ref[b]                                   # SMEM scalar read
        safe = jnp.minimum(nid, N - 1)
        row = h_scr[pl.ds(safe, 1), :]                     # (1,H) dynamic row load
        row = jnp.where(nid >= N, 0.0, row)
        g_scr[pl.ds(b, 1), :] = row
        return carry

    lax.fori_loop(0, BL, gather_row, 0, unroll=True)

    # Lane-dense padded output (width 128): slice stores, no in-kernel concat.
    out_ref[...] = jnp.zeros_like(out_ref)
    out_ref[:, :H] = g_scr[...]
    out_ref[:, H:H + T] = te


# ---------------------------------------------------------------------------
# Wrapper: graph preprocessing (once) + single pallas_call + reshape/slice
# ---------------------------------------------------------------------------
def rgcn_aggregator_forward(ent_embeds, rel_embeds, src, dst, etype,
                            wn1, wl1, wn2, wl2, t_w, t_b,
                            time_mat, node_ids, batch, seq_len):
    N, H = ent_embeds.shape
    R2 = rel_embeds.shape[0]
    T = t_w.shape[1]

    src = src.reshape(-1).astype(jnp.int32)
    dst = dst.reshape(-1).astype(jnp.int32)
    etype = etype.reshape(-1).astype(jnp.int32)

    # Graph-structure preprocessing (O(E), done once, shared by both layers).
    adj = jnp.zeros((N, N), jnp.float32).at[dst, src].add(1.0)
    relcnt = jnp.zeros((N, R2), jnp.float32).at[dst, etype].add(1.0)
    deg = jnp.sum(adj, axis=1, keepdims=True)                       # in-degree

    # Fuse neighbor-message and self-loop weights into one K=2H matmul/layer.
    w1 = jnp.concatenate([wn1, wl1], axis=0)                        # (2H, H)
    w2 = jnp.concatenate([wn2, wl2], axis=0)                        # (2H, H)

    ids_flat = node_ids.reshape(-1).astype(jnp.int32)               # (BL,) -> SMEM
    time_flat = time_mat.reshape(-1, 1).astype(jnp.float32)         # (BL,1) operand
    BL = ids_flat.shape[0]

    OUT_W = 128                                # lane-dense padded output width

    grid_spec = pltpu.PrefetchScalarGridSpec(
        num_scalar_prefetch=1,
        grid=(1,),
        in_specs=[
            pl.BlockSpec((N, H), lambda i, ids: (0, 0)),        # ent_embeds
            pl.BlockSpec((R2, H), lambda i, ids: (0, 0)),       # rel_embeds
            pl.BlockSpec((N, N), lambda i, ids: (0, 0)),        # adj counts
            pl.BlockSpec((N, R2), lambda i, ids: (0, 0)),       # rel counts
            pl.BlockSpec((N, 1), lambda i, ids: (0, 0)),        # in-degree
            pl.BlockSpec((2 * H, H), lambda i, ids: (0, 0)),    # fused W layer 1
            pl.BlockSpec((2 * H, H), lambda i, ids: (0, 0)),    # fused W layer 2
            pl.BlockSpec((1, T), lambda i, ids: (0, 0)),        # t_w
            pl.BlockSpec((1, T), lambda i, ids: (0, 0)),        # t_b
            pl.BlockSpec((BL, 1), lambda i, ids: (0, 0)),       # time values
        ],
        out_specs=pl.BlockSpec((BL, OUT_W), lambda i, ids: (0, 0)),
        scratch_shapes=[
            pltpu.VMEM((N, H), jnp.float32),     # final node features h2
            pltpu.VMEM((BL, H), jnp.float32),    # gathered sequence rows
        ],
    )

    flops = 2 * N * R2 * H + 2 * (2 * N * N * H + 2 * N * (2 * H) * H)
    cost = pl.CostEstimate(
        flops=flops,
        transcendentals=BL * T + N,
        bytes_accessed=4 * (N * H + R2 * H + N * N + N * R2 + N
                            + 2 * (2 * H) * H + 2 * T + BL + BL + BL * OUT_W),
    )

    out_pad = pl.pallas_call(
        fused_rgcn_seq_kernel,
        out_shape=jax.ShapeDtypeStruct((BL, OUT_W), jnp.float32),
        grid_spec=grid_spec,
        compiler_params=pltpu.CompilerParams(dimension_semantics=("arbitrary",)),
        cost_estimate=cost,
    )(ids_flat, ent_embeds, rel_embeds, adj, relcnt, deg,
      w1, w2, t_w, t_b, time_flat)

    out = out_pad[:, :H + T].reshape(batch, seq_len, H + T)
    # dropout: eval-mode identity
    return out


if __name__ == "__main__":
    key = jax.random.PRNGKey(0)

    h_dim, t_dim, seq_len = 32, 32, 8
    num_nodes, num_rels, num_edges = 16, 4, 24
    batch = 2

    ks = jax.random.split(key, 12)
    ent_embeds = jax.random.normal(ks[0], (num_nodes, h_dim), jnp.float32)
    rel_embeds = jax.random.normal(ks[1], (2 * num_rels, h_dim), jnp.float32)
    wn1 = 0.1 * jax.random.normal(ks[2], (h_dim, h_dim), jnp.float32)
    wl1 = 0.1 * jax.random.normal(ks[3], (h_dim, h_dim), jnp.float32)
    wn2 = 0.1 * jax.random.normal(ks[4], (h_dim, h_dim), jnp.float32)
    wl2 = 0.1 * jax.random.normal(ks[5], (h_dim, h_dim), jnp.float32)
    t_w = 0.01 * jax.random.normal(ks[6], (1, t_dim), jnp.float32)
    t_b = jax.random.normal(ks[7], (1, t_dim), jnp.float32)

    # synthetic graph: (src, dst, etype) edge lists, shaped (E, 1) int32
    src = jax.random.randint(ks[8], (num_edges, 1), 0, num_nodes, jnp.int32)
    dst = jax.random.randint(ks[9], (num_edges, 1), 0, num_nodes, jnp.int32)
    etype = jax.random.randint(ks[10], (num_edges, 1), 0, 2 * num_rels,
                               jnp.int32)

    # per-sequence time snapshots (variable length, padded with 1000000)
    s_len_non_zero = [5, 8]
    time_snaps = [[0, 1, 3, 4, 7], [0, 1, 2, 3, 4, 5, 6, 9]]
    time_mat = jnp.full((batch, seq_len), 1000000, jnp.int32)
    for i, snap in enumerate(time_snaps):
        time_mat = time_mat.at[i, :len(snap)].set(jnp.array(snap, jnp.int32))

    # node ids per (batch, seq); padded positions point at the padding row (==N)
    node_ids = jax.random.randint(ks[11], (batch, seq_len), 0, num_nodes,
                                  jnp.int32)
    for i, ln in enumerate(s_len_non_zero):
        node_ids = node_ids.at[i, ln:].set(num_nodes)

    out = rgcn_aggregator_forward(ent_embeds, rel_embeds, src, dst, etype,
                                  wn1, wl1, wn2, wl2, t_w, t_b,
                                  time_mat, node_ids, batch, seq_len)
    jax.block_until_ready(out)
    assert out.shape == (batch, seq_len, h_dim + t_dim)
    print("KERNEL_OK")
</pallas_src>

<mosaic_0001>
module attributes {stable_mosaic.version = 11 : i64} {
  func.func @fused_rgcn_seq_kernel(%arg0: i32, %arg1: memref<16xi32, #tpu.memory_space<smem>>, %arg2: memref<16x32xf32, #tpu.memory_space<vmem>>, %arg3: memref<8x32xf32, #tpu.memory_space<vmem>>, %arg4: memref<16x16xf32, #tpu.memory_space<vmem>>, %arg5: memref<16x8xf32, #tpu.memory_space<vmem>>, %arg6: memref<16x1xf32, #tpu.memory_space<vmem>>, %arg7: memref<64x32xf32, #tpu.memory_space<vmem>>, %arg8: memref<64x32xf32, #tpu.memory_space<vmem>>, %arg9: memref<1x32xf32, #tpu.memory_space<vmem>>, %arg10: memref<1x32xf32, #tpu.memory_space<vmem>>, %arg11: memref<16x1xf32, #tpu.memory_space<vmem>>, %arg12: memref<16x128xf32, #tpu.memory_space<vmem>>, %arg13: memref<16x32xf32, #tpu.memory_space<vmem>>, %arg14: memref<16x32xf32, #tpu.memory_space<vmem>>) attributes {dimension_semantics = [#tpu.dimension_semantics<arbitrary>], iteration_bounds = array<i64: 1>, scalar_prefetch = 1 : i64, scratch_operands = 2 : i64, tpu.core_type = #tpu.core_type<tc>, window_params = [{pipeline_mode = #tpu.pipeline_mode<synchronous>, transform_indices = @transform_0, window_bounds = array<i64: 16, 32>}, {pipeline_mode = #tpu.pipeline_mode<synchronous>, transform_indices = @transform_1, window_bounds = array<i64: 8, 32>}, {pipeline_mode = #tpu.pipeline_mode<synchronous>, transform_indices = @transform_2, window_bounds = array<i64: 16, 16>}, {pipeline_mode = #tpu.pipeline_mode<synchronous>, transform_indices = @transform_3, window_bounds = array<i64: 16, 8>}, {pipeline_mode = #tpu.pipeline_mode<synchronous>, transform_indices = @transform_4, window_bounds = array<i64: 16, 1>}, {pipeline_mode = #tpu.pipeline_mode<synchronous>, transform_indices = @transform_5, window_bounds = array<i64: 64, 32>}, {pipeline_mode = #tpu.pipeline_mode<synchronous>, transform_indices = @transform_6, window_bounds = array<i64: 64, 32>}, {pipeline_mode = #tpu.pipeline_mode<synchronous>, transform_indices = @transform_7, window_bounds = array<i64: 1, 32>}, {pipeline_mode = #tpu.pipeline_mode<synchronous>, transform_indices = @transform_8, window_bounds = array<i64: 1, 32>}, {pipeline_mode = #tpu.pipeline_mode<synchronous>, transform_indices = @transform_9, window_bounds = array<i64: 16, 1>}, {pipeline_mode = #tpu.pipeline_mode<synchronous>, transform_indices = @transform_10, window_bounds = array<i64: 16, 128>}]} {
    %c0 = arith.constant 0 : index
    %c0_0 = arith.constant 0 : index
    %0 = vector.load %arg6[%c0, %c0_0] : memref<16x1xf32, #tpu.memory_space<vmem>>, vector<16x1xf32>
    %cst = arith.constant 1.000000e+00 : f32
    %1 = vector.broadcast %cst : f32 to vector<16x1xf32>
    %2 = arith.maximumf %0, %1 : vector<16x1xf32>
    %3 = tpu.reciprocal %2 {approx = true} : vector<16x1xf32> -> vector<16x1xf32>
    %c0_1 = arith.constant 0 : index
    %c0_2 = arith.constant 0 : index
    %4 = vector.load %arg4[%c0_1, %c0_2] : memref<16x16xf32, #tpu.memory_space<vmem>>, vector<16x16xf32>
    %5 = arith.truncf %4 : vector<16x16xf32> to vector<16x16xbf16>
    %c0_3 = arith.constant 0 : index
    %c0_4 = arith.constant 0 : index
    %6 = vector.load %arg5[%c0_3, %c0_4] : memref<16x8xf32, #tpu.memory_space<vmem>>, vector<16x8xf32>
    %7 = arith.truncf %6 : vector<16x8xf32> to vector<16x8xbf16>
    %c0_5 = arith.constant 0 : index
    %c0_6 = arith.constant 0 : index
    %8 = vector.load %arg3[%c0_5, %c0_6] : memref<8x32xf32, #tpu.memory_space<vmem>>, vector<8x32xf32>
    %9 = arith.truncf %8 : vector<8x32xf32> to vector<8x32xbf16>
    %cst_7 = arith.constant dense<0.000000e+00> : vector<16x32xf32>
    %10 = tpu.matmul %7, %9, %cst_7 {dimension_numbers = #tpu.dot_dimension_numbers<[1], [0], [0], [1], [0, 0, 1, 1], [], []>} : vector<16x8xbf16>, vector<8x32xbf16>, vector<16x32xf32> -> vector<16x32xf32>
    %c0_8 = arith.constant 0 : index
    %c0_9 = arith.constant 0 : index
    %11 = vector.load %arg2[%c0_8, %c0_9] : memref<16x32xf32, #tpu.memory_space<vmem>>, vector<16x32xf32>
    %12 = arith.truncf %11 : vector<16x32xf32> to vector<16x32xbf16>
    %cst_10 = arith.constant dense<0.000000e+00> : vector<16x32xf32>
    %13 = tpu.matmul %5, %12, %cst_10 {dimension_numbers = #tpu.dot_dimension_numbers<[1], [0], [0], [1], [0, 0, 1, 1], [], []>} : vector<16x16xbf16>, vector<16x32xbf16>, vector<16x32xf32> -> vector<16x32xf32>
    %14 = arith.addf %13, %10 : vector<16x32xf32>
    %15 = vector.broadcast %3 : vector<16x1xf32> to vector<16x32xf32>
    %16 = arith.mulf %14, %15 : vector<16x32xf32>
    %17 = tpu.concatenate %16, %11 in 1 : vector<16x32xf32>, vector<16x32xf32> -> vector<16x64xf32>
    %18 = arith.truncf %17 : vector<16x64xf32> to vector<16x64xbf16>
    %c0_11 = arith.constant 0 : index
    %c0_12 = arith.constant 0 : index
    %19 = vector.load %arg7[%c0_11, %c0_12] : memref<64x32xf32, #tpu.memory_space<vmem>>, vector<64x32xf32>
    %20 = arith.truncf %19 : vector<64x32xf32> to vector<64x32xbf16>
    %cst_13 = arith.constant dense<0.000000e+00> : vector<16x32xf32>
    %21 = tpu.matmul %18, %20, %cst_13 {dimension_numbers = #tpu.dot_dimension_numbers<[1], [0], [0], [1], [0, 0, 1, 1], [], []>} : vector<16x64xbf16>, vector<64x32xbf16>, vector<16x32xf32> -> vector<16x32xf32>
    %cst_14 = arith.constant 0.000000e+00 : f32
    %22 = vector.broadcast %cst_14 : f32 to vector<16x32xf32>
    %23 = arith.cmpf oge, %21, %22 : vector<16x32xf32>
    %cst_15 = arith.constant 0.229166672 : f32
    %24 = vector.broadcast %cst_15 : f32 to vector<16x32xf32>
    %25 = arith.mulf %24, %21 : vector<16x32xf32>
    %26 = arith.select %23, %21, %25 : vector<16x32xi1>, vector<16x32xf32>
    %27 = arith.truncf %26 : vector<16x32xf32> to vector<16x32xbf16>
    %cst_16 = arith.constant dense<0.000000e+00> : vector<16x32xf32>
    %28 = tpu.matmul %5, %27, %cst_16 {dimension_numbers = #tpu.dot_dimension_numbers<[1], [0], [0], [1], [0, 0, 1, 1], [], []>} : vector<16x16xbf16>, vector<16x32xbf16>, vector<16x32xf32> -> vector<16x32xf32>
    %29 = arith.addf %28, %10 : vector<16x32xf32>
    %30 = vector.broadcast %3 : vector<16x1xf32> to vector<16x32xf32>
    %31 = arith.mulf %29, %30 : vector<16x32xf32>
    %32 = tpu.concatenate %31, %26 in 1 : vector<16x32xf32>, vector<16x32xf32> -> vector<16x64xf32>
    %33 = arith.truncf %32 : vector<16x64xf32> to vector<16x64xbf16>
    %c0_17 = arith.constant 0 : index
    %c0_18 = arith.constant 0 : index
    %34 = vector.load %arg8[%c0_17, %c0_18] : memref<64x32xf32, #tpu.memory_space<vmem>>, vector<64x32xf32>
    %35 = arith.truncf %34 : vector<64x32xf32> to vector<64x32xbf16>
    %cst_19 = arith.constant dense<0.000000e+00> : vector<16x32xf32>
    %36 = tpu.matmul %33, %35, %cst_19 {dimension_numbers = #tpu.dot_dimension_numbers<[1], [0], [0], [1], [0, 0, 1, 1], [], []>} : vector<16x64xbf16>, vector<64x32xbf16>, vector<16x32xf32> -> vector<16x32xf32>
    %cst_20 = arith.constant 0.000000e+00 : f32
    %37 = vector.broadcast %cst_20 : f32 to vector<16x32xf32>
    %38 = arith.cmpf oge, %36, %37 : vector<16x32xf32>
    %cst_21 = arith.constant 0.229166672 : f32
    %39 = vector.broadcast %cst_21 : f32 to vector<16x32xf32>
    %40 = arith.mulf %39, %36 : vector<16x32xf32>
    %41 = arith.select %38, %36, %40 : vector<16x32xi1>, vector<16x32xf32>
    %c0_22 = arith.constant 0 : index
    %c0_23 = arith.constant 0 : index
    %42 = vector.load %arg13[%c0_22, %c0_23] : memref<16x32xf32, #tpu.memory_space<vmem>>, vector<16x32xf32>
    tpu.vector_store %arg13[%c0_22, %c0_23], %41 {strides = array<i32>} : memref<16x32xf32, #tpu.memory_space<vmem>>, vector<16x32xf32>,
    %c0_24 = arith.constant 0 : index
    %c0_25 = arith.constant 0 : index
    %43 = vector.load %arg11[%c0_24, %c0_25] : memref<16x1xf32, #tpu.memory_space<vmem>>, vector<16x1xf32>
    %c0_26 = arith.constant 0 : index
    %c0_27 = arith.constant 0 : index
    %44 = vector.load %arg9[%c0_26, %c0_27] : memref<1x32xf32, #tpu.memory_space<vmem>>, vector<1x32xf32>
    %45 = vector.broadcast %43 : vector<16x1xf32> to vector<16x32xf32>
    %46 = vector.broadcast %44 : vector<1x32xf32> to vector<16x32xf32>
    %47 = arith.mulf %45, %46 : vector<16x32xf32>
    %c0_28 = arith.constant 0 : index
    %c0_29 = arith.constant 0 : index
    %48 = vector.load %arg10[%c0_28, %c0_29] : memref<1x32xf32, #tpu.memory_space<vmem>>, vector<1x32xf32>
    %49 = vector.broadcast %48 : vector<1x32xf32> to vector<16x32xf32>
    %50 = arith.addf %47, %49 : vector<16x32xf32>
    %51 = math.cos %50 : vector<16x32xf32>
    %c0_i32 = arith.constant 0 : i32
    %52 = arith.index_cast %c0_i32 : i32 to index
    %53 = memref.load %arg1[%52] : memref<16xi32, #tpu.memory_space<smem>>
    %c15_i32 = arith.constant 15 : i32
    %54 = arith.minsi %53, %c15_i32 : i32
    %55 = arith.index_cast %54 : i32 to index
    %c0_30 = arith.constant 0 : index
    %56 = vector.load %arg13[%55, %c0_30] : memref<16x32xf32, #tpu.memory_space<vmem>>, vector<1x32xf32>
    %c16_i32 = arith.constant 16 : i32
    %57 = arith.cmpi sge, %53, %c16_i32 : i32
    %cst_31 = arith.constant 0.000000e+00 : f32
    %58 = vector.broadcast %cst_31 : f32 to vector<1x32xf32>
    %59 = arith.select %57, %58, %56 : vector<1x32xf32>
    %60 = arith.index_cast %c0_i32 : i32 to index
    %c0_32 = arith.constant 0 : index
    %61 = vector.load %arg14[%60, %c0_32] : memref<16x32xf32, #tpu.memory_space<vmem>>, vector<1x32xf32>
    tpu.vector_store %arg14[%60, %c0_32], %59 {strides = array<i32>} : memref<16x32xf32, #tpu.memory_space<vmem>>, vector<1x32xf32>,
    %c1_i32 = arith.constant 1 : i32
    %62 = arith.index_cast %c1_i32 : i32 to index
    %63 = memref.load %arg1[%62] : memref<16xi32, #tpu.memory_space<smem>>
    %c15_i32_33 = arith.constant 15 : i32
    %64 = arith.minsi %63, %c15_i32_33 : i32
    %65 = arith.index_cast %64 : i32 to index
    %c0_34 = arith.constant 0 : index
    %66 = vector.load %arg13[%65, %c0_34] : memref<16x32xf32, #tpu.memory_space<vmem>>, vector<1x32xf32>
    %c16_i32_35 = arith.constant 16 : i32
    %67 = arith.cmpi sge, %63, %c16_i32_35 : i32
    %cst_36 = arith.constant 0.000000e+00 : f32
    %68 = vector.broadcast %cst_36 : f32 to vector<1x32xf32>
    %69 = arith.select %67, %68, %66 : vector<1x32xf32>
    %70 = arith.index_cast %c1_i32 : i32 to index
    %c0_37 = arith.constant 0 : index
    %71 = vector.load %arg14[%70, %c0_37] : memref<16x32xf32, #tpu.memory_space<vmem>>, vector<1x32xf32>
    tpu.vector_store %arg14[%70, %c0_37], %69 {strides = array<i32>} : memref<16x32xf32, #tpu.memory_space<vmem>>, vector<1x32xf32>,
    %c2_i32 = arith.constant 2 : i32
    %72 = arith.index_cast %c2_i32 : i32 to index
    %73 = memref.load %arg1[%72] : memref<16xi32, #tpu.memory_space<smem>>
    %c15_i32_38 = arith.constant 15 : i32
    %74 = arith.minsi %73, %c15_i32_38 : i32
    %75 = arith.index_cast %74 : i32 to index
    %c0_39 = arith.constant 0 : index
    %76 = vector.load %arg13[%75, %c0_39] : memref<16x32xf32, #tpu.memory_space<vmem>>, vector<1x32xf32>
    %c16_i32_40 = arith.constant 16 : i32
    %77 = arith.cmpi sge, %73, %c16_i32_40 : i32
    %cst_41 = arith.constant 0.000000e+00 : f32
    %78 = vector.broadcast %cst_41 : f32 to vector<1x32xf32>
    %79 = arith.select %77, %78, %76 : vector<1x32xf32>
    %80 = arith.index_cast %c2_i32 : i32 to index
    %c0_42 = arith.constant 0 : index
    %81 = vector.load %arg14[%80, %c0_42] : memref<16x32xf32, #tpu.memory_space<vmem>>, vector<1x32xf32>
    tpu.vector_store %arg14[%80, %c0_42], %79 {strides = array<i32>} : memref<16x32xf32, #tpu.memory_space<vmem>>, vector<1x32xf32>,
    %c3_i32 = arith.constant 3 : i32
    %82 = arith.index_cast %c3_i32 : i32 to index
    %83 = memref.load %arg1[%82] : memref<16xi32, #tpu.memory_space<smem>>
    %c15_i32_43 = arith.constant 15 : i32
    %84 = arith.minsi %83, %c15_i32_43 : i32
    %85 = arith.index_cast %84 : i32 to index
    %c0_44 = arith.constant 0 : index
    %86 = vector.load %arg13[%85, %c0_44] : memref<16x32xf32, #tpu.memory_space<vmem>>, vector<1x32xf32>
    %c16_i32_45 = arith.constant 16 : i32
    %87 = arith.cmpi sge, %83, %c16_i32_45 : i32
    %cst_46 = arith.constant 0.000000e+00 : f32
    %88 = vector.broadcast %cst_46 : f32 to vector<1x32xf32>
    %89 = arith.select %87, %88, %86 : vector<1x32xf32>
    %90 = arith.index_cast %c3_i32 : i32 to index
    %c0_47 = arith.constant 0 : index
    %91 = vector.load %arg14[%90, %c0_47] : memref<16x32xf32, #tpu.memory_space<vmem>>, vector<1x32xf32>
    tpu.vector_store %arg14[%90, %c0_47], %89 {strides = array<i32>} : memref<16x32xf32, #tpu.memory_space<vmem>>, vector<1x32xf32>,
    %c4_i32 = arith.constant 4 : i32
    %92 = arith.index_cast %c4_i32 : i32 to index
    %93 = memref.load %arg1[%92] : memref<16xi32, #tpu.memory_space<smem>>
    %c15_i32_48 = arith.constant 15 : i32
    %94 = arith.minsi %93, %c15_i32_48 : i32
    %95 = arith.index_cast %94 : i32 to index
    %c0_49 = arith.constant 0 : index
    %96 = vector.load %arg13[%95, %c0_49] : memref<16x32xf32, #tpu.memory_space<vmem>>, vector<1x32xf32>
    %c16_i32_50 = arith.constant 16 : i32
    %97 = arith.cmpi sge, %93, %c16_i32_50 : i32
    %cst_51 = arith.constant 0.000000e+00 : f32
    %98 = vector.broadcast %cst_51 : f32 to vector<1x32xf32>
    %99 = arith.select %97, %98, %96 : vector<1x32xf32>
    %100 = arith.index_cast %c4_i32 : i32 to index
    %c0_52 = arith.constant 0 : index
    %101 = vector.load %arg14[%100, %c0_52] : memref<16x32xf32, #tpu.memory_space<vmem>>, vector<1x32xf32>
    tpu.vector_store %arg14[%100, %c0_52], %99 {strides = array<i32>} : memref<16x32xf32, #tpu.memory_space<vmem>>, vector<1x32xf32>,
    %c5_i32 = arith.constant 5 : i32
    %102 = arith.index_cast %c5_i32 : i32 to index
    %103 = memref.load %arg1[%102] : memref<16xi32, #tpu.memory_space<smem>>
    %c15_i32_53 = arith.constant 15 : i32
    %104 = arith.minsi %103, %c15_i32_53 : i32
    %105 = arith.index_cast %104 : i32 to index
    %c0_54 = arith.constant 0 : index
    %106 = vector.load %arg13[%105, %c0_54] : memref<16x32xf32, #tpu.memory_space<vmem>>, vector<1x32xf32>
    %c16_i32_55 = arith.constant 16 : i32
    %107 = arith.cmpi sge, %103, %c16_i32_55 : i32
    %cst_56 = arith.constant 0.000000e+00 : f32
    %108 = vector.broadcast %cst_56 : f32 to vector<1x32xf32>
    %109 = arith.select %107, %108, %106 : vector<1x32xf32>
    %110 = arith.index_cast %c5_i32 : i32 to index
    %c0_57 = arith.constant 0 : index
    %111 = vector.load %arg14[%110, %c0_57] : memref<16x32xf32, #tpu.memory_space<vmem>>, vector<1x32xf32>
    tpu.vector_store %arg14[%110, %c0_57], %109 {strides = array<i32>} : memref<16x32xf32, #tpu.memory_space<vmem>>, vector<1x32xf32>,
    %c6_i32 = arith.constant 6 : i32
    %112 = arith.index_cast %c6_i32 : i32 to index
    %113 = memref.load %arg1[%112] : memref<16xi32, #tpu.memory_space<smem>>
    %c15_i32_58 = arith.constant 15 : i32
    %114 = arith.minsi %113, %c15_i32_58 : i32
    %115 = arith.index_cast %114 : i32 to index
    %c0_59 = arith.constant 0 : index
    %116 = vector.load %arg13[%115, %c0_59] : memref<16x32xf32, #tpu.memory_space<vmem>>, vector<1x32xf32>
    %c16_i32_60 = arith.constant 16 : i32
    %117 = arith.cmpi sge, %113, %c16_i32_60 : i32
    %cst_61 = arith.constant 0.000000e+00 : f32
    %118 = vector.broadcast %cst_61 : f32 to vector<1x32xf32>
    %119 = arith.select %117, %118, %116 : vector<1x32xf32>
    %120 = arith.index_cast %c6_i32 : i32 to index
    %c0_62 = arith.constant 0 : index
    %121 = vector.load %arg14[%120, %c0_62] : memref<16x32xf32, #tpu.memory_space<vmem>>, vector<1x32xf32>
    tpu.vector_store %arg14[%120, %c0_62], %119 {strides = array<i32>} : memref<16x32xf32, #tpu.memory_space<vmem>>, vector<1x32xf32>,
    %c7_i32 = arith.constant 7 : i32
    %122 = arith.index_cast %c7_i32 : i32 to index
    %123 = memref.load %arg1[%122] : memref<16xi32, #tpu.memory_space<smem>>
    %c15_i32_63 = arith.constant 15 : i32
    %124 = arith.minsi %123, %c15_i32_63 : i32
    %125 = arith.index_cast %124 : i32 to index
    %c0_64 = arith.constant 0 : index
    %126 = vector.load %arg13[%125, %c0_64] : memref<16x32xf32, #tpu.memory_space<vmem>>, vector<1x32xf32>
    %c16_i32_65 = arith.constant 16 : i32
    %127 = arith.cmpi sge, %123, %c16_i32_65 : i32
    %cst_66 = arith.constant 0.000000e+00 : f32
    %128 = vector.broadcast %cst_66 : f32 to vector<1x32xf32>
    %129 = arith.select %127, %128, %126 : vector<1x32xf32>
    %130 = arith.index_cast %c7_i32 : i32 to index
    %c0_67 = arith.constant 0 : index
    %131 = vector.load %arg14[%130, %c0_67] : memref<16x32xf32, #tpu.memory_space<vmem>>, vector<1x32xf32>
    tpu.vector_store %arg14[%130, %c0_67], %129 {strides = array<i32>} : memref<16x32xf32, #tpu.memory_space<vmem>>, vector<1x32xf32>,
    %c8_i32 = arith.constant 8 : i32
    %132 = arith.index_cast %c8_i32 : i32 to index
    %133 = memref.load %arg1[%132] : memref<16xi32, #tpu.memory_space<smem>>
    %c15_i32_68 = arith.constant 15 : i32
    %134 = arith.minsi %133, %c15_i32_68 : i32
    %135 = arith.index_cast %134 : i32 to index
    %c0_69 = arith.constant 0 : index
    %136 = vector.load %arg13[%135, %c0_69] : memref<16x32xf32, #tpu.memory_space<vmem>>, vector<1x32xf32>
    %c16_i32_70 = arith.constant 16 : i32
    %137 = arith.cmpi sge, %133, %c16_i32_70 : i32
    %cst_71 = arith.constant 0.000000e+00 : f32
    %138 = vector.broadcast %cst_71 : f32 to vector<1x32xf32>
    %139 = arith.select %137, %138, %136 : vector<1x32xf32>
    %140 = arith.index_cast %c8_i32 : i32 to index
    %c0_72 = arith.constant 0 : index
    %141 = vector.load %arg14[%140, %c0_72] : memref<16x32xf32, #tpu.memory_space<vmem>>, vector<1x32xf32>
    tpu.vector_store %arg14[%140, %c0_72], %139 {strides = array<i32>} : memref<16x32xf32, #tpu.memory_space<vmem>>, vector<1x32xf32>,
    %c9_i32 = arith.constant 9 : i32
    %142 = arith.index_cast %c9_i32 : i32 to index
    %143 = memref.load %arg1[%142] : memref<16xi32, #tpu.memory_space<smem>>
    %c15_i32_73 = arith.constant 15 : i32
    %144 = arith.minsi %143, %c15_i32_73 : i32
    %145 = arith.index_cast %144 : i32 to index
    %c0_74 = arith.constant 0 : index
    %146 = vector.load %arg13[%145, %c0_74] : memref<16x32xf32, #tpu.memory_space<vmem>>, vector<1x32xf32>
    %c16_i32_75 = arith.constant 16 : i32
    %147 = arith.cmpi sge, %143, %c16_i32_75 : i32
    %cst_76 = arith.constant 0.000000e+00 : f32
    %148 = vector.broadcast %cst_76 : f32 to vector<1x32xf32>
    %149 = arith.select %147, %148, %146 : vector<1x32xf32>
    %150 = arith.index_cast %c9_i32 : i32 to index
    %c0_77 = arith.constant 0 : index
    %151 = vector.load %arg14[%150, %c0_77] : memref<16x32xf32, #tpu.memory_space<vmem>>, vector<1x32xf32>
    tpu.vector_store %arg14[%150, %c0_77], %149 {strides = array<i32>} : memref<16x32xf32, #tpu.memory_space<vmem>>, vector<1x32xf32>,
    %c10_i32 = arith.constant 10 : i32
    %152 = arith.index_cast %c10_i32 : i32 to index
    %153 = memref.load %arg1[%152] : memref<16xi32, #tpu.memory_space<smem>>
    %c15_i32_78 = arith.constant 15 : i32
    %154 = arith.minsi %153, %c15_i32_78 : i32
    %155 = arith.index_cast %154 : i32 to index
    %c0_79 = arith.constant 0 : index
    %156 = vector.load %arg13[%155, %c0_79] : memref<16x32xf32, #tpu.memory_space<vmem>>, vector<1x32xf32>
    %c16_i32_80 = arith.constant 16 : i32
    %157 = arith.cmpi sge, %153, %c16_i32_80 : i32
    %cst_81 = arith.constant 0.000000e+00 : f32
    %158 = vector.broadcast %cst_81 : f32 to vector<1x32xf32>
    %159 = arith.select %157, %158, %156 : vector<1x32xf32>
    %160 = arith.index_cast %c10_i32 : i32 to index
    %c0_82 = arith.constant 0 : index
    %161 = vector.load %arg14[%160, %c0_82] : memref<16x32xf32, #tpu.memory_space<vmem>>, vector<1x32xf32>
    tpu.vector_store %arg14[%160, %c0_82], %159 {strides = array<i32>} : memref<16x32xf32, #tpu.memory_space<vmem>>, vector<1x32xf32>,
    %c11_i32 = arith.constant 11 : i32
    %162 = arith.index_cast %c11_i32 : i32 to index
    %163 = memref.load %arg1[%162] : memref<16xi32, #tpu.memory_space<smem>>
    %c15_i32_83 = arith.constant 15 : i32
    %164 = arith.minsi %163, %c15_i32_83 : i32
    %165 = arith.index_cast %164 : i32 to index
    %c0_84 = arith.constant 0 : index
    %166 = vector.load %arg13[%165, %c0_84] : memref<16x32xf32, #tpu.memory_space<vmem>>, vector<1x32xf32>
    %c16_i32_85 = arith.constant 16 : i32
    %167 = arith.cmpi sge, %163, %c16_i32_85 : i32
    %cst_86 = arith.constant 0.000000e+00 : f32
    %168 = vector.broadcast %cst_86 : f32 to vector<1x32xf32>
    %169 = arith.select %167, %168, %166 : vector<1x32xf32>
    %170 = arith.index_cast %c11_i32 : i32 to index
    %c0_87 = arith.constant 0 : index
    %171 = vector.load %arg14[%170, %c0_87] : memref<16x32xf32, #tpu.memory_space<vmem>>, vector<1x32xf32>
    tpu.vector_store %arg14[%170, %c0_87], %169 {strides = array<i32>} : memref<16x32xf32, #tpu.memory_space<vmem>>, vector<1x32xf32>,
    %c12_i32 = arith.constant 12 : i32
    %172 = arith.index_cast %c12_i32 : i32 to index
    %173 = memref.load %arg1[%172] : memref<16xi32, #tpu.memory_space<smem>>
    %c15_i32_88 = arith.constant 15 : i32
    %174 = arith.minsi %173, %c15_i32_88 : i32
    %175 = arith.index_cast %174 : i32 to index
    %c0_89 = arith.constant 0 : index
    %176 = vector.load %arg13[%175, %c0_89] : memref<16x32xf32, #tpu.memory_space<vmem>>, vector<1x32xf32>
    %c16_i32_90 = arith.constant 16 : i32
    %177 = arith.cmpi sge, %173, %c16_i32_90 : i32
    %cst_91 = arith.constant 0.000000e+00 : f32
    %178 = vector.broadcast %cst_91 : f32 to vector<1x32xf32>
    %179 = arith.select %177, %178, %176 : vector<1x32xf32>
    %180 = arith.index_cast %c12_i32 : i32 to index
    %c0_92 = arith.constant 0 : index
    %181 = vector.load %arg14[%180, %c0_92] : memref<16x32xf32, #tpu.memory_space<vmem>>, vector<1x32xf32>
    tpu.vector_store %arg14[%180, %c0_92], %179 {strides = array<i32>} : memref<16x32xf32, #tpu.memory_space<vmem>>, vector<1x32xf32>,
    %c13_i32 = arith.constant 13 : i32
    %182 = arith.index_cast %c13_i32 : i32 to index
    %183 = memref.load %arg1[%182] : memref<16xi32, #tpu.memory_space<smem>>
    %c15_i32_93 = arith.constant 15 : i32
    %184 = arith.minsi %183, %c15_i32_93 : i32
    %185 = arith.index_cast %184 : i32 to index
    %c0_94 = arith.constant 0 : index
    %186 = vector.load %arg13[%185, %c0_94] : memref<16x32xf32, #tpu.memory_space<vmem>>, vector<1x32xf32>
    %c16_i32_95 = arith.constant 16 : i32
    %187 = arith.cmpi sge, %183, %c16_i32_95 : i32
    %cst_96 = arith.constant 0.000000e+00 : f32
    %188 = vector.broadcast %cst_96 : f32 to vector<1x32xf32>
    %189 = arith.select %187, %188, %186 : vector<1x32xf32>
    %190 = arith.index_cast %c13_i32 : i32 to index
    %c0_97 = arith.constant 0 : index
    %191 = vector.load %arg14[%190, %c0_97] : memref<16x32xf32, #tpu.memory_space<vmem>>, vector<1x32xf32>
    tpu.vector_store %arg14[%190, %c0_97], %189 {strides = array<i32>} : memref<16x32xf32, #tpu.memory_space<vmem>>, vector<1x32xf32>,
    %c14_i32 = arith.constant 14 : i32
    %192 = arith.index_cast %c14_i32 : i32 to index
    %193 = memref.load %arg1[%192] : memref<16xi32, #tpu.memory_space<smem>>
    %c15_i32_98 = arith.constant 15 : i32
    %194 = arith.minsi %193, %c15_i32_98 : i32
    %195 = arith.index_cast %194 : i32 to index
    %c0_99 = arith.constant 0 : index
    %196 = vector.load %arg13[%195, %c0_99] : memref<16x32xf32, #tpu.memory_space<vmem>>, vector<1x32xf32>
    %c16_i32_100 = arith.constant 16 : i32
    %197 = arith.cmpi sge, %193, %c16_i32_100 : i32
    %cst_101 = arith.constant 0.000000e+00 : f32
    %198 = vector.broadcast %cst_101 : f32 to vector<1x32xf32>
    %199 = arith.select %197, %198, %196 : vector<1x32xf32>
    %200 = arith.index_cast %c14_i32 : i32 to index
    %c0_102 = arith.constant 0 : index
    %201 = vector.load %arg14[%200, %c0_102] : memref<16x32xf32, #tpu.memory_space<vmem>>, vector<1x32xf32>
    tpu.vector_store %arg14[%200, %c0_102], %199 {strides = array<i32>} : memref<16x32xf32, #tpu.memory_space<vmem>>, vector<1x32xf32>,
    %c15_i32_103 = arith.constant 15 : i32
    %202 = arith.index_cast %c15_i32_103 : i32 to index
    %203 = memref.load %arg1[%202] : memref<16xi32, #tpu.memory_space<smem>>
    %c15_i32_104 = arith.constant 15 : i32
    %204 = arith.minsi %203, %c15_i32_104 : i32
    %205 = arith.index_cast %204 : i32 to index
    %c0_105 = arith.constant 0 : index
    %206 = vector.load %arg13[%205, %c0_105] : memref<16x32xf32, #tpu.memory_space<vmem>>, vector<1x32xf32>
    %c16_i32_106 = arith.constant 16 : i32
    %207 = arith.cmpi sge, %203, %c16_i32_106 : i32
    %cst_107 = arith.constant 0.000000e+00 : f32
    %208 = vector.broadcast %cst_107 : f32 to vector<1x32xf32>
    %209 = arith.select %207, %208, %206 : vector<1x32xf32>
    %210 = arith.index_cast %c15_i32_103 : i32 to index
    %c0_108 = arith.constant 0 : index
    %211 = vector.load %arg14[%210, %c0_108] : memref<16x32xf32, #tpu.memory_space<vmem>>, vector<1x32xf32>
    tpu.vector_store %arg14[%210, %c0_108], %209 {strides = array<i32>} : memref<16x32xf32, #tpu.memory_space<vmem>>, vector<1x32xf32>,
    %c16_i32_109 = arith.constant 16 : i32
    %cst_110 = arith.constant 0.000000e+00 : f32
    %212 = vector.broadcast %cst_110 : f32 to vector<16x128xf32>
    %c0_111 = arith.constant 0 : index
    %c0_112 = arith.constant 0 : index
    %213 = vector.load %arg12[%c0_111, %c0_112] : memref<16x128xf32, #tpu.memory_space<vmem>>, vector<16x128xf32>
    tpu.vector_store %arg12[%c0_111, %c0_112], %212 {strides = array<i32>} : memref<16x128xf32, #tpu.memory_space<vmem>>, vector<16x128xf32>,
    %c0_113 = arith.constant 0 : index
    %c0_114 = arith.constant 0 : index
    %214 = vector.load %arg14[%c0_113, %c0_114] : memref<16x32xf32, #tpu.memory_space<vmem>>, vector<16x32xf32>
    %c0_115 = arith.constant 0 : index
    %c0_116 = arith.constant 0 : index
    %215 = vector.load %arg12[%c0_115, %c0_116] : memref<16x128xf32, #tpu.memory_space<vmem>>, vector<16x32xf32>
    tpu.vector_store %arg12[%c0_115, %c0_116], %214 {strides = array<i32>} : memref<16x128xf32, #tpu.memory_space<vmem>>, vector<16x32xf32>,
    %c0_117 = arith.constant 0 : index
    %c32 = arith.constant 32 : index
    %216 = vector.load %arg12[%c0_117, %c32] : memref<16x128xf32, #tpu.memory_space<vmem>>, vector<16x32xf32>
    tpu.vector_store %arg12[%c0_117, %c32], %51 {strides = array<i32>} : memref<16x128xf32, #tpu.memory_space<vmem>>, vector<16x32xf32>,
    return
  }
  func.func @transform_0(%arg0: i32, %arg1: memref<16xi32, #tpu.memory_space<smem>>) -> (i32, i32) {
    %c0_i32 = arith.constant 0 : i32
    %c0_i32_0 = arith.constant 0 : i32
    %c0_i32_1 = arith.constant 0 : i32
    return %c0_i32, %c0_i32_0 : i32, i32
  }
  func.func @transform_1(%arg0: i32, %arg1: memref<16xi32, #tpu.memory_space<smem>>) -> (i32, i32) {
    %c0_i32 = arith.constant 0 : i32
    %c0_i32_0 = arith.constant 0 : i32
    %c0_i32_1 = arith.constant 0 : i32
    return %c0_i32, %c0_i32_0 : i32, i32
  }
  func.func @transform_2(%arg0: i32, %arg1: memref<16xi32, #tpu.memory_space<smem>>) -> (i32, i32) {
    %c0_i32 = arith.constant 0 : i32
    %c0_i32_0 = arith.constant 0 : i32
    %c0_i32_1 = arith.constant 0 : i32
    return %c0_i32, %c0_i32_0 : i32, i32
  }
  func.func @transform_3(%arg0: i32, %arg1: memref<16xi32, #tpu.memory_space<smem>>) -> (i32, i32) {
    %c0_i32 = arith.constant 0 : i32
    %c0_i32_0 = arith.constant 0 : i32
    %c0_i32_1 = arith.constant 0 : i32
    return %c0_i32, %c0_i32_0 : i32, i32
  }
  func.func @transform_4(%arg0: i32, %arg1: memref<16xi32, #tpu.memory_space<smem>>) -> (i32, i32) {
    %c0_i32 = arith.constant 0 : i32
    %c0_i32_0 = arith.constant 0 : i32
    %c0_i32_1 = arith.constant 0 : i32
    return %c0_i32, %c0_i32_0 : i32, i32
  }
  func.func @transform_5(%arg0: i32, %arg1: memref<16xi32, #tpu.memory_space<smem>>) -> (i32, i32) {
    %c0_i32 = arith.constant 0 : i32
    %c0_i32_0 = arith.constant 0 : i32
    %c0_i32_1 = arith.constant 0 : i32
    return %c0_i32, %c0_i32_0 : i32, i32
  }
  func.func @transform_6(%arg0: i32, %arg1: memref<16xi32, #tpu.memory_space<smem>>) -> (i32, i32) {
    %c0_i32 = arith.constant 0 : i32
    %c0_i32_0 = arith.constant 0 : i32
    %c0_i32_1 = arith.constant 0 : i32
    return %c0_i32, %c0_i32_0 : i32, i32
  }
  func.func @transform_7(%arg0: i32, %arg1: memref<16xi32, #tpu.memory_space<smem>>) -> (i32, i32) {
    %c0_i32 = arith.constant 0 : i32
    %c0_i32_0 = arith.constant 0 : i32
    %c0_i32_1 = arith.constant 0 : i32
    return %c0_i32, %c0_i32_0 : i32, i32
  }
  func.func @transform_8(%arg0: i32, %arg1: memref<16xi32, #tpu.memory_space<smem>>) -> (i32, i32) {
    %c0_i32 = arith.constant 0 : i32
    %c0_i32_0 = arith.constant 0 : i32
    %c0_i32_1 = arith.constant 0 : i32
    return %c0_i32, %c0_i32_0 : i32, i32
  }
  func.func @transform_9(%arg0: i32, %arg1: memref<16xi32, #tpu.memory_space<smem>>) -> (i32, i32) {
    %c0_i32 = arith.constant 0 : i32
    %c0_i32_0 = arith.constant 0 : i32
    %c0_i32_1 = arith.constant 0 : i32
    return %c0_i32, %c0_i32_0 : i32, i32
  }
  func.func @transform_10(%arg0: i32, %arg1: memref<16xi32, #tpu.memory_space<smem>>) -> (i32, i32) {
    %c0_i32 = arith.constant 0 : i32
    %c0_i32_0 = arith.constant 0 : i32
    %c0_i32_1 = arith.constant 0 : i32
    return %c0_i32, %c0_i32_0 : i32, i32
  }
}

</mosaic_0001>

<bundles_post_ra>
// kernel: tpu_custom_call.1
= control target key start
LH: loop header
LB: loop body
LE: loop exit
PB: predicated region body
PF: predicated region fallthrough
CT: control target
= control target key end

     0   :  { %s885_s20 = smov [#allocation5]   ;;  %s1480_s0 = inlined_call_operand.vmem [shape: s32[16], index: 0, kind: input, shape index: {}]   ;;  %s1481_s1 = inlined_call_operand.vmem [shape: f32[16,32], index: 1, kind: input, shape index: {}]   ;;  %s1482_s2 = inlined_call_operand.vmem [shape: f32[8,32], index: 2, kind: input, shape index: {}]   ;;  %s1483_s3 = inlined_call_operand.vmem [shape: f32[16,16], index: 3, kind: input, shape index: {}]   ;;  %s1484_s4 = inlined_call_operand.vmem [shape: f32[16,8], index: 4, kind: input, shape index: {}]   ;;  %s1485_s5 = inlined_call_operand.vmem [shape: f32[16,1], index: 5, kind: input, shape index: {}]   ;;  %s1486_s6 = inlined_call_operand.vmem [shape: f32[64,32], index: 6, kind: input, shape index: {}]   ;;  %s1487_s7 = inlined_call_operand.vmem [shape: f32[64,32], index: 7, kind: input, shape index: {}]   ;;  %s1488_s8 = inlined_call_operand.vmem [shape: f32[1,32], index: 8, kind: input, shape index: {}]   ;;  %s1489_s9 = inlined_call_operand.vmem [shape: f32[1,32], index: 9, kind: input, shape index: {}]   ;;  %s1490_s10 = inlined_call_operand.vmem [shape: f32[16,1], index: 10, kind: input, shape index: {}]   ;;  %s1491_s11 = inlined_call_operand.hbm [shape: f32[16,128], index: 11, kind: output, shape index: {}]  }
   0x1   :  { %1492 = sst [smem:[#allocation11_spill]] %s1491_s11  ;;  %s17_s19 = sshll.u32 %s1480_s0, 4  ;;  %s18_s19 = int_to_ptr.vmem [resolvable:$true] %s17_s19 }
   0x2   :  { %20 = dma.vmem_to_smem %s18_s19, 16, %s885_s20, [#allocation4] }
   0x3   :  { %881 = dma.done.wait [#allocation4], 16 }
   0x4   :  { %882 = vsyncadd [#allocation4], 4294967280 }
   0x5   :  { %23 = sfence }
   0x6   :  { %v82_v0 = vld [vmem:[%s1481_s1] sm:$0xff]  ;;  %v83_v1 = vld [vmem:[%s1481_s1 + $0x8] sm:$0xff]  ;;  %vm64_vm0 = vcmask 1043456   ;;  %v886_v11 = vmov 0   ;;  %vm85_vm1 = vcmask 130048   ;;  %vm60_vm2 = vcmask 64512  }
   0x7   :  { %v58_v2 = vld [vmem:[%s1482_s2] sm:$0xff]  ;;  %v84_v3 = vpack.c.bf16 %v83_v1, %v82_v0  ;;  %v53_v6 = vld [vmem:[%s1483_s3 + $0x8] sm:$0xff]  ;;  %v828_v8 = vpack.i.bf16 %v83_v1, %v82_v0  ;;  %827 = vset.pattern.permute.xlu0 %v886_v11  ;;  %838 = vset.pattern.permute.xlu2 %v886_v11 }
   0x8   :  { %v59_v4 = vpack.c.bf16 %v58_v2, %v58_v2  ;;  %v52_v5 = vld [vmem:[%s1483_s3] sm:$0xff]  ;;  %v56_v10 = vld [vmem:[%s1484_s4 + $0x8] sm:$0xff]  ;;  %s887_s3 = smov 32  }
   0x9   :  { %v55_v7 = vld [vmem:[%s1484_s4] sm:$0xff]  ;;  %v979_v9 = vpack.c.bf16 %v53_v6, %v52_v5  ;;  %96 = vmatpush.bf16.msra.mxu1 %v84_v3  ;;  %829 = vrot.lane.b32.xlu1 %v828_v8, %s887_s3  ;;  %v47_v16 = vld [vmem:[%s1485_s5 + $0x8] sm:$0xff] }
   0xa   :  { %v46_v12 = vld [vmem:[%s1485_s5] sm:$0xff]  ;;  %v66_v13 = vsel %vm64_vm0, %v59_v4, 0  ;;  %v57_v14 = vpack.c.bf16 %v56_v10, %v55_v7 }
   0xb   :  { %v48_v15 = vmax.f32 %v46_v12, 1.0  ;;  %75 = vmatpush.bf16.msra.mxu0 %v66_v13 }
   0xc   :  { %24 = vsyncpa [#allocation7], 0  ;;  %789 = vmatmul.msk.bf16.vlgmr.msra.gmra.mxu1 %vm85_vm1, %v979_v9  ;;  %v49_v17 = vmax.f32 %v47_v16, 1.0  ;;  %v133_v20 = vld [vmem:[%s1486_s6 + $0x30] sm:$0xff]  ;;  %v134_v21 = vld [vmem:[%s1486_s6 + $0x38] sm:$0xff]  ;;  %vm123_vm3 = vcmask 261120  }
   0xd   :  { %841 = vrcp.f32 %v48_v15  ;;  %v138_v22 = vpack.c.bf16 %v134_v21, %v133_v20  ;;  %v131_v23 = vld [vmem:[%s1486_s6 + $0x20] sm:$0xff]  ;;  %v132_v24 = vld [vmem:[%s1486_s6 + $0x28] sm:$0xff]  ;;  %v129_v26 = vld [vmem:[%s1486_s6 + $0x10] sm:$0xff]  ;;  %vm139_vm4 = vcmask 523264   ;;  %v888_v10 = vmov 683565275  }
   0xe   :  { %788 = vmatmul.msk.bf16.vlgmr.msra.gmra.mxu0 %vm60_vm2, %v57_v14  ;;  %843 = vrcp.f32 %v49_v17  ;;  %v137_v25 = vpack.c.bf16 %v132_v24, %v131_v23  ;;  %v130_v27 = vld [vmem:[%s1486_s6 + $0x18] sm:$0xff]  ;;  %v127_v29 = vld [vmem:[%s1486_s6] sm:$0xff]  ;;  %v128_v30 = vld [vmem:[%s1486_s6 + $0x8] sm:$0xff]  ;;  %v889_v14 = vmov 2475754826   ;;  %s799_s26 = sld [smem:[#allocation5 + $0x1]] }
   0xf   :  { %147 = vmatpush.bf16.msra.mxu2 %v138_v22  ;;  %v136_v28 = vpack.c.bf16 %v130_v27, %v129_v26  ;;  %v135_v31 = vpack.c.bf16 %v128_v30, %v127_v29  ;;  %v228_v32 = vld [vmem:[%s1490_s10] sm:$0xff]  ;;  %v229_v33 = vld [vmem:[%s1490_s10 + $0x8] sm:$0xff]  ;;  %v890_v20 = vmov 2131351028   ;;  %v891_v23 = vmov 2102212464  }
  0x10   :  { %233 = vperm.xlu2 %838, %v228_v32   ;;  %v839_v50 = vld [vmem:[%s1488_s8] ss:$0 sm:$0xff]  ;;  %v892_v26 = vmov 920167782   ;;  %s800_s0 = sld [smem:[#allocation5 + $0x2]] }
  0x11   :  { %v840_v52 = vld [vmem:[%s1489_s9] ss:$0 sm:$0xff]  ;;  %s801_s27 = sld [smem:[#allocation5 + $0x3]] }
  0x12   :  { %s802_s29 = sld [smem:[#allocation5 + $0x4]] }
  0x13   :  { %v842_v18 = vpop.eup %841  ;;  %148 = vmatpush.bf16.msra.mxu2 %v137_v25  ;;  %s803_s12 = sld [smem:[#allocation5 + $0x5]] }
  0x14   :  { %105 = vperm.xlu0 %827, %v842_v18   ;;  %v844_v19 = vpop.eup %843  ;;  %p573_p2 = scmp.lt.s32.totalorder %s799_s26, 15  ;;  %p577_p3 = scmp.ge.s32.totalorder %s799_s26, 16 }
  0x15   :  { %s804_s2 = sld [smem:[#allocation5 + $0x6]] }
  0x16   :  { %p584_p4 = scmp.lt.s32.totalorder %s800_s0, 15  ;;  %s1535_s26 = smov (!%p573_p2, %s799_s26), 15 }
  0x17   :  { %149 = vmatpush.bf16.msra.mxu2 %v136_v28  ;;  %p588_p5 = scmp.ge.s32.totalorder %s800_s0, 16  ;;  %p595_p6 = scmp.lt.s32.totalorder %s801_s27, 15 }
  0x18   :  { %238 = vperm.xlu2 %838, %v229_v33   ;;  %v893_v33 = vmov 1326507024   ;;  %s1259_s30 = scalar_select %p577_p3, 1, 0 }
  0x19   :  { %s1537_s0 = smov (!%p584_p4, %s800_s0), 15  ;;  %p599_p7 = scmp.ge.s32.totalorder %s801_s27, 16 }
  0x1a   :  { %s1263_s1 = scalar_select %p588_p5, 1, 0 }
  0x1b   :  { %150 = vmatpush.bf16.msra.mxu2 %v135_v31  ;;  %p606_p8 = scmp.lt.s32.totalorder %s802_s29, 15  ;;  %s1539_s27 = smov (!%p595_p6, %s801_s27), 15 }
  0x1c   :  { %110 = vperm.xlu0 %827, %v844_v19   ;;  %p610_p9 = scmp.ge.s32.totalorder %s802_s29, 16  ;;  %p617_p10 = scmp.lt.s32.totalorder %s803_s12, 15 }
  0x1d   :  { %s1267_s6 = scalar_select %p599_p7, 1, 0 }
  0x1e   :  { %s1541_s29 = smov (!%p606_p8, %s802_s29), 15  ;;  %s805_s10 = sld [smem:[#allocation5 + $0x7]] }
  0x1f   :  { %s1271_s13 = scalar_select %p610_p9, 1, 0 }
  0x20   :  { %p621_p11 = scmp.ge.s32.totalorder %s803_s12, 16  ;;  %p628_p12 = scmp.lt.s32.totalorder %s804_s2, 15 }
  0x21   :  { %s806_s14 = sld [smem:[#allocation5 + $0x8]]  ;;  %s1543_s12 = smov (!%p617_p10, %s803_s12), 15 }
  0x22   :  { %p632_p13 = scmp.ge.s32.totalorder %s804_s2, 16  ;;  %s1545_s2 = smov (!%p628_p12, %s804_s2), 15 }
  0x23   :  { %s1275_s8 = scalar_select %p621_p11, 1, 0 }
  0x24   :  { %s807_s9 = sld [smem:[#allocation5 + $0x9]] }
  0x25   :  { %s1279_s4 = scalar_select %p632_p13, 1, 0 }
  0x26   :  { %s808_s15 = sld [smem:[#allocation5 + $0xa]] }
  0x27   :  { %p650_p2 = scmp.lt.s32.totalorder %s806_s14, 15  ;;  %p654_p3 = scmp.ge.s32.totalorder %s806_s14, 16 }
  0x28   :  { %s809_s18 = sld [smem:[#allocation5 + $0xb]] }
  0x29   :  { %s1549_s14 = smov (!%p650_p2, %s806_s14), 15  ;;  %s810_s19 = sld [smem:[#allocation5 + $0xc]] }
  0x2a   :  { %p661_p4 = scmp.lt.s32.totalorder %s807_s9, 15  ;;  %p665_p5 = scmp.ge.s32.totalorder %s807_s9, 16 }
  0x2b   :  { %s1287_s17 = scalar_select %p654_p3, 1, 0 }
  0x2c   :  { %p672_p6 = scmp.lt.s32.totalorder %s808_s15, 15  ;;  %s1551_s9 = smov (!%p661_p4, %s807_s9), 15 }
  0x2d   :  { %p676_p7 = scmp.ge.s32.totalorder %s808_s15, 16  ;;  %s811_s5 = sld [smem:[#allocation5 + $0xd]] }
  0x2e   :  { %s1553_s15 = smov (!%p672_p6, %s808_s15), 15  ;;  %p683_p8 = scmp.lt.s32.totalorder %s809_s18, 15 }
  0x2f   :  { %s1295_s20 = scalar_select %p676_p7, 1, 0 }
  0x30   :  { %p687_p9 = scmp.ge.s32.totalorder %s809_s18, 16  ;;  %s1297_s21 = sld [smem:[#allocation5 + $0xe]] }
  0x31   :  { %p694_p10 = scmp.lt.s32.totalorder %s810_s19, 15  ;;  %p698_p11 = scmp.ge.s32.totalorder %s810_s19, 16 }
  0x32   :  { %s1555_s18 = smov (!%p683_p8, %s809_s18), 15  ;;  %s1304_s23 = sld [smem:[#allocation5 + $0xf]] }
  0x33   :  { %s1301_s22 = scalar_select %p687_p9, 1, 0 }
  0x34   :  { %p705_p12 = scmp.lt.s32.totalorder %s811_s5, 15  ;;  %s1557_s19 = smov (!%p694_p10, %s810_s19), 15 }
  0x35   :  { %p709_p13 = scmp.ge.s32.totalorder %s811_s5, 16 }
  0x36   :  { %s1308_s24 = scalar_select %p698_p11, 1, 0 }
  0x37   :  { %s1559_s5 = smov (!%p705_p12, %s811_s5), 15 }
  0x38   :  { %1497 = sst [smem:[#allocation10_spill]] %s1559_s5  ;;  %p727_p2 = scmp.lt.s32.totalorder %s1304_s23, 15 }
  0x39   :  { %s1313_s25 = scalar_select %p709_p13, 1, 0 }
  0x3a   :  { %p731_p3 = scmp.ge.s32.totalorder %s1304_s23, 16 }
  0x3b   :  { %s1331_s5 = scalar_select %p727_p2, %s1304_s23, 15 }
  0x6a   :  { %v234_v51 = vpop.permute.xlu2 %233 }
  0x6b   :  { %v244_v53 = vmul.f32 %v839_v50, %v234_v51 }
  0x6d   :  { %v1046_v54 = vadd.f32 %v840_v52, %v244_v53 }
  0x6f   :  { %v255_v55 = vand.u32 2139095040, %v1046_v54  ;;  %v252_v7 = vand.u32 2147483647, %v1046_v54 }
  0x71   :  { %v256_v56 = vshrl.u32 %v255_v55, 23  ;;  %v259_v13 = vand.u32 8388607, %v252_v7 }
  0x72   :  { %v239_v59 = vpop.permute.xlu2 %238 }
  0x73   :  { %v793_v57 = vadd.s32 4294967169, %v256_v56  ;;  %v245_v60 = vmul.f32 %v839_v50, %v239_v59  ;;  %v260_v18 = vor.u32 8388608, %v259_v13 }
  0x75   :  { %v262_v58 = vadd.s32 1, %v793_v57  ;;  %v1049_v61 = vadd.f32 %v840_v52, %v245_v60 }
  0x77   :  { %vm263_vm5 = vcmp.gt.s32.totalorder %v262_v58, 0  ;;  %v409_v62 = vand.u32 2139095040, %v1049_v61 }
  0x78   :  { %v264_v63 = vsel %vm263_vm5, %v262_v58, 0 }
  0x79   :  { %v410_v0 = vshrl.u32 %v409_v62, 23  ;;  %v266_v2 = vand.u32 31, %v264_v63  ;;  %v265_v4 = vshrl.u32 %v264_v63, 5 }
  0x7b   :  { %v830_v38 = vpop.permute.xlu1 %829  ;;  %v796_v1 = vadd.s32 4294967169, %v410_v0  ;;  %v267_v5 = vsub.s32 32, %v266_v2  ;;  %v269_v12 = vshll.u32 %v888_v10, %v266_v2  ;;  %v272_v16 = vshll.u32 %v889_v14, %v266_v2 }
  0x7c   :  { %v832_v42 = vunpack.i.h.bf16 %v830_v38  ;;  %v831_v43 = vunpack.i.l.bf16 %v830_v38  ;;  %vm284_vm7 = vcmp.lt.s32.totalorder %v265_v4, 1  ;;  %v275_v22 = vshll.u32 %v890_v20, %v266_v2 }
  0x7d   :  { %v416_v3 = vadd.s32 1, %v796_v1  ;;  %v270_v15 = vshrl.u32 %v889_v14, %v267_v5  ;;  %v268_v17 = vshrl.u32 %v888_v10, %v267_v5  ;;  %v273_v21 = vshrl.u32 %v890_v20, %v267_v5 }
  0x7e   :  { %v276_v24 = vshrl.u32 %v891_v23, %v267_v5  ;;  %v278_v25 = vshll.u32 %v891_v23, %v266_v2  ;;  %v279_v27 = vshrl.u32 %v892_v26, %v267_v5  ;;  %v281_v28 = vshll.u32 %v892_v26, %v266_v2 }
  0x7f   :  { %vm417_vm6 = vcmp.gt.s32.totalorder %v416_v3, 0  ;;  %v271_v19 = vor.u32 %v270_v15, %v269_v12  ;;  %v274_v30 = vor.u32 %v273_v21, %v272_v16  ;;  %vm286_vm8 = vcmp.lt.s32.totalorder %v265_v4, 3 }
  0x80   :  { %v418_v6 = vsel %vm417_vm6, %v416_v3, 0  ;;  %v277_v31 = vor.u32 %v276_v24, %v275_v22  ;;  %v280_v32 = vor.u32 %v279_v27, %v278_v25  ;;  %vm287_vm9 = vcmp.lt.s32.totalorder %v265_v4, 4 }
  0x81   :  { %v1053_v8 = vand.u32 31, %v418_v6  ;;  %vm285_vm10 = vcmp.lt.s32.totalorder %v265_v4, 2  ;;  %v292_v38 = vsel %vm284_vm7, %v271_v19, %v274_v30  ;;  %v1082_v53 = vshrl.u32 %v418_v6, 5 }
  0x83   :  { %v1068_v29 = vsub.s32 32, %v1053_v8  ;;  %v423_v60 = vshll.u32 %v888_v10, %v1053_v8  ;;  %v426_v21 = vshll.u32 %v889_v14, %v1053_v8  ;;  %vm438_vm2 = vcmp.lt.s32.totalorder %v1082_v53, 1 }
  0x84   :  { %vm440_vm5 = vcmp.lt.s32.totalorder %v1082_v53, 3  ;;  %vm441_vm6 = vcmp.lt.s32.totalorder %v1082_v53, 4 }
  0x85   :  { %v424_v62 = vshrl.u32 %v889_v14, %v1068_v29  ;;  %v427_v14 = vshrl.u32 %v890_v20, %v1068_v29 }
  0x86   :  { %v1025_v35 = vpop.permute.xlu0 %105 }
  0x87   :  { %v1097_v13 = vor.u32 %v424_v62, %v423_v60  ;;  %v435_v60 = vshll.u32 %v892_v26, %v1053_v8 }
  0x89   :  { %v98_v34 = vpop.f32.mrf.mxu1 }
  0x8b   :  { %v1027_v36 = vpop.f32.mrf.mxu0 }
  0x8c   :  { %v99_v37 = vadd.f32 %v98_v34, %v1027_v36  ;;  %v282_v34 = vshrl.u32 %v893_v33, %v267_v5 }
  0x8e   :  { %v113_v41 = vmul.f32 %v1025_v35, %v99_v37  ;;  %v1034_v45 = vpop.permute.xlu0 %110  ;;  %v288_v37 = vsel %vm284_vm7, %v268_v17, %v271_v19 }
  0x90   :  { %v124_v47 = vsel %vm123_vm3, %v113_v41, %v831_v43  ;;  %v283_v41 = vor.u32 %v282_v34, %v281_v28  ;;  %v293_v43 = vsel %vm287_vm9, %v280_v32, 920167782 }
  0x91   :  { %v100_v39 = vpop.f32.mrf.mxu1 }
  0x92   :  { %v297_v51 = vsel %vm287_vm9, %v283_v41, 1326507024 }
  0x93   :  { %v1030_v40 = vpop.f32.mrf.mxu0  ;;  %v298_v55 = vsel %vm286_vm8, %v280_v32, %v297_v51  ;;  %v1111_v51 = vor.u32 %v427_v14, %v426_v21 }
  0x94   :  { %v101_v44 = vadd.f32 %v100_v39, %v1030_v40  ;;  %v1073_v39 = vshll.u32 %v260_v18, 8 }
  0x96   :  { %v114_v46 = vmul.f32 %v1034_v45, %v101_v44  ;;  %v406_v44 = vand.u32 2147483647, %v1049_v61  ;;  %v302_v52 = vshrl.u32 %v1073_v39, 16 }
  0x98   :  { %v125_v48 = vsel %vm123_vm3, %v114_v46, %v832_v42  ;;  %v289_v42 = vsel %vm287_vm9, %v277_v31, 2102212464  ;;  %v1095_v2 = vand.u32 8388607, %v406_v44 }
  0x99   :  { %v126_v49 = vpack.c.bf16 %v125_v48, %v124_v47  ;;  %v290_v46 = vsel %vm286_vm8, %v274_v30, %v289_v42  ;;  %v294_v47 = vsel %vm286_vm8, %v277_v31, %v293_v43  ;;  %v296_v48 = vsel %vm284_vm7, %v274_v30, %v277_v31 }
  0x9a   :  { %v295_v50 = vsel %vm285_vm10, %v292_v38, %v294_v47  ;;  %v1086_v58 = vsel %vm285_vm10, %v288_v37, %v290_v46  ;;  %v299_v59 = vsel %vm285_vm10, %v296_v48, %v298_v55  ;;  %v429_v46 = vshll.u32 %v890_v20, %v1053_v8 }
  0x9b   :  { %790 = vmatmul.msk.bf16.vlgmr.msra.gmra.mxu2 %vm139_vm4, %v126_v49  ;;  %v301_v49 = vand.u32 65535, %v1073_v39  ;;  %v325_v56 = vand.u32 65535, %v295_v50  ;;  %v326_v57 = vshrl.u32 %v295_v50, 16  ;;  %v303_v63 = vand.u32 65535, %v299_v59 }
  0x9c   :  { %v304_v0 = vshrl.u32 %v299_v59, 16  ;;  %v432_v59 = vshll.u32 %v891_v23, %v1053_v8  ;;  %v433_v20 = vshrl.u32 %v892_v26, %v1068_v29  ;;  %v345_v8 = vmul.u32 %v1073_v39, %v1086_v58 }
  0x9d   :  { %v328_v1 = vmul.u32 %v326_v57, %v301_v49  ;;  %v327_v5 = vmul.u32 %v325_v56, %v301_v49  ;;  %v329_v6 = vmul.u32 %v325_v56, %v302_v52  ;;  %v330_v12 = vmul.u32 %v326_v57, %v302_v52 }
  0x9e   :  { %v305_v15 = vmul.u32 %v303_v63, %v301_v49  ;;  %v306_v16 = vmul.u32 %v304_v0, %v301_v49  ;;  %v307_v17 = vmul.u32 %v303_v63, %v302_v52  ;;  %v308_v18 = vmul.u32 %v304_v0, %v302_v52 }
  0x9f   :  { %v331_v19 = vshll.u32 %v328_v1, 16  ;;  %v332_v25 = vshrl.u32 %v328_v1, 16  ;;  %v333_v27 = vshll.u32 %v329_v6, 16  ;;  %v334_v41 = vshrl.u32 %v329_v6, 16 }
  0xa0   :  { %v309_v24 = vshll.u32 %v306_v16, 16  ;;  %v310_v28 = vshrl.u32 %v306_v16, 16  ;;  %v311_v30 = vshll.u32 %v307_v17, 16  ;;  %v312_v31 = vshrl.u32 %v307_v17, 16 }
  0xa1   :  { %vm335_vm12 = vc.u32 %v327_v5, %v331_v19  ;;  %v337_v37 = vadd.s32 %v331_v19, %v327_v5  ;;  %v430_v57 = vshrl.u32 %v891_v23, %v1068_v29  ;;  %v436_v1 = vshrl.u32 %v893_v33, %v1068_v29 }
  0xa2   :  { %vm313_vm13 = vc.u32 %v305_v15, %v309_v24  ;;  %v315_v32 = vadd.s32 %v309_v24, %v305_v15  ;;  %v336_v34 = vsel %vm335_vm12, 1, %v886_v11  ;;  %v414_v26 = vor.u32 8388608, %v1095_v2 }
  0xa3   :  { %v314_v38 = vsel %vm313_vm13, 1, %v886_v11  ;;  %v338_v42 = vadd.s32 %v336_v34, %v330_v12  ;;  %vm339_vm15 = vc.u32 %v337_v37, %v333_v27  ;;  %v1109_v50 = vadd.s32 %v337_v37, %v333_v27 }
  0xa4   :  { %v316_v43 = vadd.s32 %v314_v38, %v308_v18  ;;  %vm317_vm14 = vc.u32 %v315_v32, %v311_v30  ;;  %v340_v49 = vsel %vm339_vm15, 1, %v886_v11  ;;  %v1123_v6 = vor.u32 %v430_v57, %v429_v46 }
  0xa5   :  { %v318_v48 = vsel %vm317_vm14, 1, %v886_v11  ;;  %v342_v56 = vadd.s32 %v340_v49, %v338_v42  ;;  %v434_v12 = vor.u32 %v433_v20, %v432_v59  ;;  %v437_v15 = vor.u32 %v436_v1, %v435_v60 }
  0xa6   :  { %v320_v55 = vadd.s32 %v318_v48, %v316_v43  ;;  %vm439_vm8 = vcmp.lt.s32.totalorder %v1082_v53, 2  ;;  %v446_v16 = vsel %vm438_vm2, %v1097_v13, %v1111_v51  ;;  %v450_v58 = vsel %vm438_vm2, %v1111_v51, %v1123_v6 }
  0xa7   :  { %v343_v0 = vadd.s32 %v342_v56, %v332_v25  ;;  %v447_v39 = vsel %vm441_vm6, %v434_v12, 920167782  ;;  %v451_v18 = vsel %vm441_vm6, %v437_v15, 1326507024  ;;  %v1158_v24 = vshll.u32 %v414_v26, 8 }
  0xa8   :  { %v321_v63 = vadd.s32 %v320_v55, %v310_v28  ;;  %v448_v17 = vsel %vm440_vm5, %v1123_v6, %v447_v39  ;;  %v422_v57 = vshrl.u32 %v888_v10, %v1068_v29  ;;  %v443_v10 = vsel %vm441_vm6, %v1123_v6, 2102212464 }
  0xa9   :  { %v344_v23 = vadd.s32 %v343_v0, %v334_v41  ;;  %v449_v21 = vsel %vm439_vm8, %v446_v16, %v448_v17  ;;  %v455_v30 = vand.u32 65535, %v1158_v24  ;;  %vm254_vm15 = vcmp.lt.s32.totalorder %v1046_v54, 0 }
  0xaa   :  { %v479_v25 = vand.u32 65535, %v449_v21  ;;  %v480_v27 = vshrl.u32 %v449_v21, 16 }
  0xab   :  { %v348_v33 = vadd.s32 1, %v344_v23 }
  0xac   :  { %v482_v14 = vmul.u32 %v480_v27, %v455_v30 }
  0xae   :  { %v485_v55 = vshll.u32 %v482_v14, 16  ;;  %v486_v16 = vshrl.u32 %v482_v14, 16 }
 0x11e   :  { %v152_v3 = vpop.f32.mrf.mxu2 }
 0x11f   :  { %vm157_vm11 = vcmp.ge.f32.partialorder %v152_v3, 0.0  ;;  %v159_v4 = vmul.f32 0.22916667, %v152_v3 }
 0x121   :  { %v161_v22 = vsel %vm157_vm11, %v152_v3, %v159_v4  ;;  %v1125_v4 = vadd.s32 %v321_v63, %v312_v31  ;;  %v456_v31 = vshrl.u32 %v1158_v24, 16 }
 0x123   :  { %vm347_vm7 = vc.u32 %v1125_v4, %v1109_v50  ;;  %v483_v43 = vmul.u32 %v479_v25, %v456_v31  ;;  %v484_v59 = vmul.u32 %v480_v27, %v456_v31 }
 0x124   :  { %v349_v2 = vsel %vm347_vm7, %v348_v33, %v344_v23  ;;  %v442_v33 = vsel %vm438_vm2, %v422_v57, %v1097_v13 }
 0x125   :  { %v350_v19 = vadd.s32 %v349_v2, %v345_v8  ;;  %v444_v2 = vsel %vm440_vm5, %v1111_v51, %v443_v10 }
 0x126   :  { %v154_v47 = vpop.f32.mrf.mxu2  ;;  %v445_v13 = vsel %vm439_vm8, %v442_v33, %v444_v2 }
 0x127   :  { %vm158_vm0 = vcmp.ge.f32.partialorder %v154_v47, 0.0  ;;  %v160_v52 = vmul.f32 0.22916667, %v154_v47  ;;  %v351_v28 = vadd.s32 536870912, %v350_v19 }
 0x129   :  { %v162_v62 = vsel %vm158_vm0, %v154_v47, %v160_v52  ;;  %v1164_v37 = vshrl.u32 %v351_v28, 30  ;;  %v481_v47 = vmul.u32 %v479_v25, %v455_v30  ;;  %vm1192_vm0 = vcmp.le.f32.partialorder %v252_v7, 0.7853982 }
 0x12a   :  { %v833_v3 = vpack.i.bf16 %v162_v62, %v161_v22  ;;  %v163_v5 = vpack.c.bf16 %v162_v62, %v161_v22  ;;  %v452_v22 = vsel %vm440_vm5, %v434_v12, %v451_v18  ;;  %v487_v62 = vshll.u32 %v483_v43, 16 }
 0x12b   :  { %v353_v46 = vshll.u32 %v1164_v37, 30  ;;  %vm489_vm10 = vc.u32 %v481_v47, %v485_v55  ;;  %v488_v18 = vshrl.u32 %v483_v43, 16 }
 0x12c   :  { %834 = vrot.lane.b32.xlu1 %v833_v3, %s887_s3  ;;  %171 = vmatpush.bf16.msra.mxu3 %v163_v5  ;;  %v490_v3 = vsel %vm489_vm10, 1, %v886_v11  ;;  %v491_v5 = vadd.s32 %v485_v55, %v481_v47  ;;  %vm1209_vm10 = vcmp.le.f32.partialorder %v406_v44, 0.7853982 }
 0x12d   :  { %v354_v56 = vsub.s32 %v350_v19, %v353_v46  ;;  %v492_v23 = vadd.s32 %v490_v3, %v484_v59  ;;  %v346_v19 = vadd.s32 %v1109_v50, %v1125_v4 }
 0x12e   :  { %vm493_vm12 = vc.u32 %v491_v5, %v487_v62 }
 0x12f   :  { %791 = vmatmul.msk.bf16.vlgmr.msra.gmra.mxu3 %vm85_vm1, %v979_v9  ;;  %v453_v9 = vsel %vm439_vm8, %v450_v58, %v452_v22  ;;  %vm355_vm9 = vcmp.lt.s32.totalorder %v354_v56, 0  ;;  %v356_v63 = vsub.s32 0, %v354_v56  ;;  %v494_v39 = vsel %vm493_vm12, 1, %v886_v11 }
 0x130   :  { %v457_v32 = vand.u32 65535, %v453_v9  ;;  %v458_v34 = vshrl.u32 %v453_v9, 16  ;;  %v496_v17 = vadd.s32 %v494_v39, %v492_v23  ;;  %v495_v22 = vadd.s32 %v491_v5, %v487_v62 }
 0x131   :  { %v357_v12 = vsel %vm355_vm9, %v356_v63, %v354_v56  ;;  %vm408_vm9 = vcmp.lt.s32.totalorder %v1049_v61, 0 }
 0x132   :  { %v461_v38 = vmul.u32 %v457_v32, %v456_v31  ;;  %v459_v41 = vmul.u32 %v457_v32, %v455_v30  ;;  %v460_v42 = vmul.u32 %v458_v34, %v455_v30  ;;  %v462_v48 = vmul.u32 %v458_v34, %v456_v31 }
 0x133   :  { %v358_v15 = vclz %v357_v12  ;;  %v497_v25 = vadd.s32 %v496_v17, %v486_v16  ;;  %v499_v32 = vmul.u32 %v1158_v24, %v445_v13 }
 0x134   :  { %v463_v49 = vshll.u32 %v460_v42, 16  ;;  %v465_v52 = vshll.u32 %v461_v38, 16  ;;  %v464_v20 = vshrl.u32 %v460_v42, 16  ;;  %v466_v8 = vshrl.u32 %v461_v38, 16 }
 0x135   :  { %v794_v58 = vadd.s32 4294967294, %v358_v15  ;;  %v498_v30 = vadd.s32 %v497_v25, %v488_v18 }
 0x136   :  { %vm467_vm1 = vc.u32 %v459_v41, %v463_v49  ;;  %v469_v60 = vadd.s32 %v463_v49, %v459_v41 }
 0x137   :  { %v468_v0 = vsel %vm467_vm1, 1, %v886_v11  ;;  %vm795_vm13 = vcmp.lt.s32.totalorder %v794_v58, 0  ;;  %v502_v34 = vadd.s32 1, %v498_v30  ;;  %vm395_vm1 = vweird.f32 %v1046_v54 }
 0x138   :  { %v470_v1 = vadd.s32 %v468_v0, %v462_v48  ;;  %vm471_vm11 = vc.u32 %v469_v60, %v465_v52  ;;  %v361_v9 = vsel %vm795_vm13, 0, %v794_v58 }
 0x139   :  { %v472_v29 = vsel %vm471_vm11, 1, %v886_v11  ;;  %v362_v11 = vsub.s32 32, %v361_v9  ;;  %v363_v27 = vshll.u32 %v354_v56, %v361_v9  ;;  %v366_v28 = vsub.s32 4294967266, %v361_v9 }
 0x13a   :  { %v474_v26 = vadd.s32 %v472_v29, %v470_v1  ;;  %v376_v56 = vsub.s32 4, %v1164_v37 }
 0x13b   :  { %v364_v31 = vshrl.u32 %v346_v19, %v362_v11  ;;  %v367_v51 = vadd.s32 127, %v366_v28 }
 0x13c   :  { %v475_v6 = vadd.s32 %v474_v26, %v464_v20  ;;  %v377_v63 = vsel %vm254_vm15, %v376_v56, %v1164_v37 }
 0x13d   :  { %v365_v38 = vor.u32 %v364_v31, %v363_v27  ;;  %v368_v50 = vshll.u32 %v367_v51, 23  ;;  %v379_v12 = vsel %vm1192_vm0, 0, %v377_v63 }
 0x13e   :  { %v476_v21 = vadd.s32 %v475_v6, %v466_v8  ;;  %v396_v33 = vand.u32 3, %v379_v12  ;;  %v198_v12 = vld [vmem:[%s1487_s7 + $0x38] sm:$0xff] }
 0x13f   :  { %v369_v41 = vor.u32 4788187, %v368_v50  ;;  %v372_v42 = vcvt.s32.f32 %v365_v38  ;;  %v623_v38 = vstv %s1275_s8 }
 0x140   :  { %vm501_vm14 = vc.u32 %v476_v21, %v495_v22  ;;  %v500_v23 = vadd.s32 %v495_v22, %v476_v21  ;;  %vm401_vm6 = vcmp.eq.s32.totalorder %v396_v33, 2  ;;  %vm398_vm7 = vcmp.eq.s32.totalorder %v396_v33, 0 }
 0x141   :  { %v503_v4 = vsel %vm501_vm14, %v502_v34, %v498_v30  ;;  %v370_v43 = vand.u32 2147483647, %v369_v41  ;;  %vm397_vm8 = vcmp.lt.s32.totalorder %v396_v33, 2  ;;  %vm549_vm14 = vweird.f32 %v1049_v61  ;;  %v191_v33 = vld [vmem:[%s1487_s7] sm:$0xff] }
 0x142   :  { %v504_v14 = vadd.s32 %v503_v4, %v499_v32 }
 0x143   :  { %v373_v46 = vmul.f32 %v372_v42, %v370_v43 }
 0x144   :  { %v505_v53 = vadd.s32 536870912, %v504_v14 }
 0x145   :  { %v374_v24 = vxor.u32 2147483648, %v373_v46 }
 0x146   :  { %v1187_v47 = vshrl.u32 %v505_v53, 30 }
 0x147   :  { %v375_v52 = vsel %vm254_vm15, %v374_v24, %v373_v46 }
 0x148   :  { %v507_v49 = vshll.u32 %v1187_v47, 30  ;;  %v378_v57 = vsel %vm1192_vm0, %v1046_v54, %v375_v52  ;;  %v530_v41 = vsub.s32 4, %v1187_v47 }
 0x149   :  { %v380_v59 = vmul.f32 %v378_v57, %v378_v57 }
 0x14a   :  { %v508_v55 = vsub.s32 %v504_v14, %v507_v49  ;;  %v531_v53 = vsel %vm408_vm9, %v530_v41, %v1187_v47 }
 0x14b   :  { %v381_v60 = vmul.f32 -0.001358992, %v380_v59  ;;  %v388_v62 = vmul.f32 -0.00019511016, %v380_v59  ;;  %v533_v44 = vsel %vm1209_vm10, 0, %v531_v53 }
 0x14c   :  { %vm509_vm2 = vcmp.lt.s32.totalorder %v508_v55, 0  ;;  %v510_v20 = vsub.s32 0, %v508_v55  ;;  %v550_v56 = vand.u32 3, %v533_v44 }
 0x14d   :  { %v382_v1 = vadd.f32 0.041655596, %v381_v60  ;;  %v389_v3 = vadd.f32 0.008332121, %v388_v62 }
 0x14e   :  { %v511_v7 = vsel %vm509_vm2, %v510_v20, %v508_v55  ;;  %vm555_vm11 = vcmp.eq.s32.totalorder %v550_v56, 2  ;;  %vm552_vm12 = vcmp.eq.s32.totalorder %v550_v56, 0  ;;  %vm551_vm13 = vcmp.lt.s32.totalorder %v550_v56, 2 }
 0x14f   :  { %v512_v0 = vclz %v511_v7  ;;  %v383_v10 = vmul.f32 %v382_v1, %v380_v59  ;;  %v390_v29 = vmul.f32 %v389_v3, %v380_v59  ;;  %vm570_vm2 = vcmask 253952  }
 0x150   :  { %v656_v56 = vstv %s1287_s17 }
 0x151   :  { %v797_v5 = vadd.s32 4294967294, %v512_v0  ;;  %v384_v15 = vadd.f32 -0.4999988, %v383_v10  ;;  %v391_v8 = vadd.f32 -0.16666654, %v390_v29  ;;  %v195_v29 = vld [vmem:[%s1487_s7 + $0x20] sm:$0xff] }
 0x153   :  { %vm798_vm5 = vcmp.lt.s32.totalorder %v797_v5, 0  ;;  %v385_v2 = vmul.f32 %v384_v15, %v380_v59  ;;  %v392_v37 = vmul.f32 %v391_v8, %v380_v59  ;;  %v193_v15 = vld [vmem:[%s1487_s7 + $0x10] sm:$0xff]  ;;  %v194_v8 = vld [vmem:[%s1487_s7 + $0x18] sm:$0xff] }
 0x154   :  { %v515_v26 = vsel %vm798_vm5, 0, %v797_v5  ;;  %v197_v5 = vld [vmem:[%s1487_s7 + $0x30] sm:$0xff] }
 0x155   :  { %v516_v16 = vsub.s32 32, %v515_v26  ;;  %v517_v39 = vshll.u32 %v508_v55, %v515_v26  ;;  %v520_v58 = vsub.s32 4294967266, %v515_v26  ;;  %v386_v18 = vadd.f32 1.0, %v385_v2 }
 0x156   :  { %v393_v19 = vadd.f32 1.0, %v392_v37  ;;  %v202_v10 = vpack.c.bf16 %v198_v12, %v197_v5  ;;  %v200_v26 = vpack.c.bf16 %v194_v8, %v193_v15  ;;  %v689_v5 = vstv %s1301_s22 }
 0x157   :  { %v518_v6 = vshrl.u32 %v500_v23, %v516_v16  ;;  %v521_v17 = vadd.s32 127, %v520_v58  ;;  %v402_v11 = vxor.u32 2147483648, %v386_v18  ;;  %v192_v16 = vld [vmem:[%s1487_s7 + $0x8] sm:$0xff] }
 0x158   :  { %v394_v25 = vmul.f32 %v393_v19, %v378_v57  ;;  %210 = vmatpush.bf16.msrb.mxu0 %v202_v10 }
 0x159   :  { %v519_v9 = vor.u32 %v518_v6, %v517_v39  ;;  %v522_v13 = vshll.u32 %v521_v17, 23  ;;  %v199_v39 = vpack.c.bf16 %v192_v16, %v191_v33 }
 0x15a   :  { %v399_v27 = vxor.u32 2147483648, %v394_v25  ;;  %v403_v28 = vsel %vm401_vm6, %v402_v11, %v394_v25 }
 0x15b   :  { %v523_v21 = vor.u32 4788187, %v522_v13  ;;  %v526_v22 = vcvt.s32.f32 %v519_v9 }
 0x15c   :  { %v400_v31 = vsel %vm398_vm7, %v386_v18, %v399_v27 }
 0x15d   :  { %v524_v30 = vand.u32 2147483647, %v523_v21  ;;  %v404_v51 = vsel %vm397_vm8, %v400_v31, %v403_v28  ;;  %v579_v31 = vstv %s1259_s30 }
 0x15e   :  { %v405_v34 = vsel %vm395_vm1, nan, %v404_v51  ;;  %v590_v51 = vstv %s1263_s1  ;;  %vm1337_vm5 = vcmp.eq.s32.totalorder %v579_v31, 1  ;;  %vm1353_vm1 = vcmp.eq.s32.totalorder %v623_v38, 1  ;;  %s575_s1 = scalar_lea.vmem [#allocation2], %s1535_s26  ;;  %s619_s26 = scalar_lea.vmem [#allocation2], %s1543_s12 }
 0x15f   :  { %v527_v32 = vmul.f32 %v526_v22, %v524_v30  ;;  %745 = vrot.lane.b32.xlu0 %v405_v34, %s887_s3  ;;  %v612_v34 = vstv %s1271_s13  ;;  %vm1341_vm6 = vcmp.eq.s32.totalorder %v590_v51, 1  ;;  %s597_s13 = scalar_lea.vmem [#allocation2], %s1539_s27  ;;  %s663_s12 = scalar_lea.vmem [#allocation2], %s1551_s9 }
 0x160   :  { %vm1349_vm8 = vcmp.eq.s32.totalorder %v612_v34, 1 }
 0x161   :  { %v528_v50 = vxor.u32 2147483648, %v527_v32 }
 0x163   :  { %v529_v4 = vsel %vm408_vm9, %v528_v50, %v527_v32  ;;  %v601_v32 = vstv %s1267_s6  ;;  %s586_s6 = scalar_lea.vmem [#allocation2], %s1537_s0  ;;  %s630_s0 = scalar_lea.vmem [#allocation2], %s1545_s2 }
 0x164   :  { %v532_v54 = vsel %vm1209_vm10, %v1049_v61, %v529_v4  ;;  %v196_v61 = vld [vmem:[%s1487_s7 + $0x28] sm:$0xff]  ;;  %s560_s7 = sld [smem:[#allocation5]]  ;;  %vm1345_vm7 = vcmp.eq.s32.totalorder %v601_v32, 1  ;;  %s674_s2 = scalar_lea.vmem [#allocation2], %s1553_s15 }
 0x165   :  { %v534_v42 = vmul.f32 %v532_v54, %v532_v54  ;;  %v201_v23 = vpack.c.bf16 %v196_v61, %v195_v29  ;;  %v700_v61 = vstv %s1308_s24  ;;  %s895_s15 = smov [#allocation6]  }
 0x167   :  { %v535_v14 = vmul.f32 -0.001358992, %v534_v42  ;;  %v542_v43 = vmul.f32 -0.00019511016, %v534_v42  ;;  %211 = vmatpush.bf16.msrb.mxu0 %v201_v23 }
 0x169   :  { %v536_v46 = vadd.f32 0.041655596, %v535_v14  ;;  %v543_v48 = vadd.f32 0.008332121, %v542_v43  ;;  %v634_v43 = vstv %s1279_s4  ;;  %s729_s4 = scalar_lea.vmem [#allocation2], %s1331_s5  ;;  %s896_s5 = smov 128  }
 0x16a   :  { %p561_p0 = scmp.lt.s32.totalorder %s560_s7, 15  ;;  %p565_p1 = scmp.ge.s32.totalorder %s560_s7, 16  ;;  %vm1378_vm9 = vcmp.eq.s32.totalorder %v634_v43, 1 }
 0x16b   :  { %v537_v24 = vmul.f32 %v536_v46, %v534_v42  ;;  %v544_v49 = vmul.f32 %v543_v48, %v534_v42  ;;  %212 = vmatpush.bf16.msrb.mxu0 %v200_v26  ;;  %v711_v26 = vstv %s1313_s25 }
 0x16c   :  { %s1533_s7 = smov (!%p561_p0, %s560_s7), 15  ;;  %p639_p0 = scmp.lt.s32.totalorder %s805_s10, 15 }
 0x16d   :  { %v538_v52 = vadd.f32 -0.4999988, %v537_v24  ;;  %v545_v55 = vadd.f32 -0.16666654, %v544_v49  ;;  %s1255_s28 = scalar_select %p565_p1, 1, 0 }
 0x16e   :  { %p643_p1 = scmp.ge.s32.totalorder %s805_s10, 16  ;;  %s1547_s10 = smov (!%p639_p0, %s805_s10), 15 }
 0x16f   :  { %v539_v57 = vmul.f32 %v538_v52, %v534_v42  ;;  %v546_v59 = vmul.f32 %v545_v55, %v534_v42  ;;  %213 = vmatpush.bf16.msrb.mxu0 %v199_v39  ;;  %p716_p0 = scmp.lt.s32.totalorder %s1297_s21, 15  ;;  %v567_v30 = vstv %s1255_s28  ;;  %s563_s30 = scalar_lea.vmem [#allocation2], %s1533_s7 }
 0x170   :  { %s1283_s16 = scalar_select %p643_p1, 1, 0  ;;  %vm1333_vm0 = vcmp.eq.s32.totalorder %v567_v30, 1 }
 0x171   :  { %v540_v20 = vadd.f32 1.0, %v539_v57  ;;  %v547_v60 = vadd.f32 1.0, %v546_v59  ;;  %p720_p1 = scmp.ge.s32.totalorder %s1297_s21, 16  ;;  %s1561_s21 = smov (!%p716_p0, %s1297_s21), 15 }
 0x172   :  { %s1360_s28 = scalar_select %p731_p3, 1, 0  ;;  %v645_v44 = vstv %s1283_s16 }
 0x173   :  { %v548_v62 = vmul.f32 %v547_v60, %v532_v54  ;;  %v556_v7 = vxor.u32 2147483648, %v540_v20  ;;  %s1328_s11 = scalar_select %p720_p1, 1, 0  ;;  %vm1387_vm10 = vcmp.eq.s32.totalorder %v645_v44, 1 }
 0x174   :  { %s608_s7 = scalar_lea.vmem [#allocation2], %s1541_s29  ;;  %s641_s27 = scalar_lea.vmem [#allocation2], %s1547_s10 }
 0x175   :  { %v553_v47 = vxor.u32 2147483648, %v548_v62  ;;  %v557_v63 = vsel %vm555_vm11, %v556_v7, %v548_v62  ;;  %vm1396_vm11 = vcmp.eq.s32.totalorder %v656_v56, 1  ;;  %s652_s29 = scalar_lea.vmem [#allocation2], %s1549_s14  ;;  %s1522_s10 = sld [smem:[#allocation10_spill]] }
 0x176   :  { %s696_s14 = scalar_lea.vmem [#allocation2], %s1557_s19  ;;  %s718_s9 = scalar_lea.vmem [#allocation2], %s1561_s21 }
 0x177   :  { %v554_v0 = vsel %vm552_vm12, %v540_v20, %v553_v47  ;;  %s758_s16 = sshll.u32 %s895_s15, 4  ;;  %s1531_s19 = sld [smem:[#allocation11_spill]]  ;;  %s759_s16 = int_to_ptr.vmem [resolvable:$true] %s758_s16 }
 0x178   :  { %v558_v1 = vsel %vm551_vm13, %v554_v0, %v557_v63  ;;  %v678_v63 = vstv %s1295_s20  ;;  %s897_s20 = smov 8  }
 0x179   :  { %v559_v3 = vsel %vm549_vm14, nan, %v558_v1  ;;  %vm1414_vm13 = vcmp.eq.s32.totalorder %v678_v63, 1  ;;  %vm1423_vm14 = vcmp.eq.s32.totalorder %v689_v5, 1 }
 0x17a   :  { %747 = vrot.lane.b32.xlu1 %v559_v3, %s887_s3  ;;  %s1291_s3 = scalar_select %p665_p5, 1, 0 }
 0x17b   :  { %s707_s8 = scalar_lea.vmem [#allocation2], %s1522_s10 }
 0x17c   :  { %v667_v60 = vstv %s1291_s3 }
 0x17d   :  { %vm1405_vm12 = vcmp.eq.s32.totalorder %v667_v60, 1  ;;  %s760_s3 = sshll.u32 %s1531_s19, 4  ;;  %s761_s3 = int_to_ptr.hbm [resolvable:$true] %s760_s3 }
 0x19e   :  { %v835_v37 = vpop.permute.xlu1 %834 }
 0x19f   :  { %v837_v19 = vunpack.i.h.bf16 %v835_v37  ;;  %v836_v9 = vunpack.i.l.bf16 %v835_v37 }
 0x1b2   :  { %v173_v58 = vpop.f32.mrf.mxu3 }
 0x1b3   :  { %v174_v2 = vadd.f32 %v173_v58, %v1027_v36  ;;  %v722_v58 = vstv %s1328_s11  ;;  %s685_s11 = scalar_lea.vmem [#allocation2], %s1555_s18 }
 0x1b5   :  { %v178_v17 = vmul.f32 %v174_v2, %v1025_v35 }
 0x1b7   :  { %v188_v25 = vsel %vm123_vm3, %v178_v17, %v836_v9  ;;  %v733_v17 = vstv %s1360_s28 }
 0x1ba   :  { %v175_v6 = vpop.f32.mrf.mxu3 }
 0x1bb   :  { %v176_v18 = vadd.f32 %v175_v6, %v1030_v40 }
 0x1bd   :  { %v179_v13 = vmul.f32 %v176_v18, %v1034_v45  ;;  %v894_v45 = vmov 0.0  }
 0x1be   :  { %737 = vst [vmem:[#allocation6] sm:$0xff] %v894_v45 }
 0x1bf   :  { %v189_v11 = vsel %vm123_vm3, %v179_v13, %v837_v19  ;;  %738 = vst [vmem:[#allocation6 + $0x8] sm:$0xff] %v894_v45 }
 0x1c0   :  { %v190_v21 = vpack.c.bf16 %v189_v11, %v188_v25 }
 0x1c2   :  { %792 = vmatmul.msk.bf16.vlgmr.msrb.gmra.mxu0 %vm139_vm4, %v190_v21 }
 0x1d1   :  { %v746_v31 = vpop.permute.xlu0 %745 }
 0x1ec   :  { %v748_v32 = vpop.permute.xlu1 %747 }
 0x23f   :  { %v215_v35 = vpop.f32.mrf.mxu0 }
 0x240   :  { %vm220_vm4 = vcmp.ge.f32.partialorder %v215_v35, 0.0  ;;  %v222_v36 = vmul.f32 0.22916667, %v215_v35 }
 0x242   :  { %v224_v40 = vsel %vm220_vm4, %v215_v35, %v222_v36  ;;  %vm1432_vm4 = vcmp.eq.s32.totalorder %v700_v61, 1 }
 0x243   :  { %226 = vst.msk [vmem:[#allocation2] sm:$0xff] %vm123_vm3, %v224_v40 }
 0x247   :  { %v217_v22 = vpop.f32.mrf.mxu0 }
 0x248   :  { %vm221_vm15 = vcmp.ge.f32.partialorder %v217_v22, 0.0  ;;  %v223_v27 = vmul.f32 0.22916667, %v217_v22 }
 0x24a   :  { %v225_v28 = vsel %vm221_vm15, %v217_v22, %v223_v27  ;;  %vm1441_vm15 = vcmp.eq.s32.totalorder %v711_v26, 1 }
 0x24b   :  { %227 = vst.msk [vmem:[#allocation2 + $0x8] sm:$0xff] %vm123_vm3, %v225_v28 }
 0x252   :  { %v564_v53 = vld [vmem:[%s563_s30] sm:$0x1] }
 0x253   :  { %v576_v46 = vld [vmem:[%s575_s1] sm:$0x1]  ;;  %v569_v24 = vsel %vm1333_vm0, 0.0, %v564_v53  ;;  %vm1449_vm0 = vcmp.eq.s32.totalorder %v722_v58, 1 }
 0x254   :  { %v587_v48 = vld [vmem:[%s586_s6] sm:$0x1]  ;;  %v581_v49 = vsel %vm1337_vm5, 0.0, %v576_v46  ;;  %571 = vst.msk [vmem:[#allocation3] sm:$0x1] %vm570_vm2, %v569_v24  ;;  %vm1457_vm5 = vcmp.eq.s32.totalorder %v733_v17, 1 }
 0x255   :  { %v592_v52 = vsel %vm1341_vm6, 0.0, %v587_v48  ;;  %v598_v55 = vld [vmem:[%s597_s13] sm:$0x1]  ;;  %582 = vst.msk [vmem:[#allocation3 + $0x1] sm:$0x1] %vm570_vm2, %v581_v49  ;;  %vm751_vm6 = vcmask 523520  }
 0x256   :  { %v603_v57 = vsel %vm1345_vm7, 0.0, %v598_v55  ;;  %v609_v59 = vld [vmem:[%s608_s7] sm:$0x1]  ;;  %593 = vst.msk [vmem:[#allocation3 + $0x2] sm:$0x1] %vm570_vm2, %v592_v52 }
 0x257   :  { %v614_v62 = vsel %vm1349_vm8, 0.0, %v609_v59  ;;  %v620_v7 = vld [vmem:[%s619_s26] sm:$0x1]  ;;  %604 = vst.msk [vmem:[#allocation3 + $0x3] sm:$0x1] %vm570_vm2, %v603_v57 }
 0x258   :  { %v625_v0 = vsel %vm1353_vm1, 0.0, %v620_v7  ;;  %v631_v1 = vld [vmem:[%s630_s0] sm:$0x1]  ;;  %615 = vst.msk [vmem:[#allocation3 + $0x4] sm:$0x1] %vm570_vm2, %v614_v62 }
 0x259   :  { %v636_v12 = vsel %vm1378_vm9, 0.0, %v631_v1  ;;  %v642_v10 = vld [vmem:[%s641_s27] sm:$0x1]  ;;  %626 = vst.msk [vmem:[#allocation3 + $0x5] sm:$0x1] %vm570_vm2, %v625_v0 }
 0x25a   :  { %v647_v23 = vsel %vm1387_vm10, 0.0, %v642_v10  ;;  %v653_v15 = vld [vmem:[%s652_s29] sm:$0x1]  ;;  %637 = vst.msk [vmem:[#allocation3 + $0x6] sm:$0x1] %vm570_vm2, %v636_v12 }
 0x25b   :  { %v658_v33 = vsel %vm1396_vm11, 0.0, %v653_v15  ;;  %v664_v16 = vld [vmem:[%s663_s12] sm:$0x1]  ;;  %648 = vst.msk [vmem:[#allocation3 + $0x7] sm:$0x1] %vm570_vm2, %v647_v23 }
 0x25c   :  { %v669_v2 = vsel %vm1405_vm12, 0.0, %v664_v16  ;;  %v675_v37 = vld [vmem:[%s674_s2] sm:$0x1]  ;;  %659 = vst.msk [vmem:[#allocation3 + $0x8] sm:$0x1] %vm570_vm2, %v658_v33 }
 0x25d   :  { %v680_v18 = vsel %vm1414_vm13, 0.0, %v675_v37  ;;  %v686_v19 = vld [vmem:[%s685_s11] sm:$0x1]  ;;  %670 = vst.msk [vmem:[#allocation3 + $0x9] sm:$0x1] %vm570_vm2, %v669_v2 }
 0x25e   :  { %v691_v13 = vsel %vm1423_vm14, 0.0, %v686_v19  ;;  %v697_v25 = vld [vmem:[%s696_s14] sm:$0x1]  ;;  %681 = vst.msk [vmem:[#allocation3 + $0xa] sm:$0x1] %vm570_vm2, %v680_v18 }
 0x25f   :  { %v702_v21 = vsel %vm1432_vm4, 0.0, %v697_v25  ;;  %v708_v35 = vld [vmem:[%s707_s8] sm:$0x1]  ;;  %692 = vst.msk [vmem:[#allocation3 + $0xb] sm:$0x1] %vm570_vm2, %v691_v13 }
 0x260   :  { %v713_v40 = vsel %vm1441_vm15, 0.0, %v708_v35  ;;  %v719_v45 = vld [vmem:[%s718_s9] sm:$0x1]  ;;  %703 = vst.msk [vmem:[#allocation3 + $0xc] sm:$0x1] %vm570_vm2, %v702_v21 }
 0x261   :  { %v724_v22 = vsel %vm1449_vm0, 0.0, %v719_v45  ;;  %v730_v27 = vld [vmem:[%s729_s4] sm:$0x1]  ;;  %714 = vst.msk [vmem:[#allocation3 + $0xd] sm:$0x1] %vm570_vm2, %v713_v40 }
 0x262   :  { %v735_v28 = vsel %vm1457_vm5, 0.0, %v730_v27  ;;  %725 = vst.msk [vmem:[#allocation3 + $0xe] sm:$0x1] %vm570_vm2, %v724_v22  ;;  %v739_v30 = vld [vmem:[#allocation3] sm:$0xff] }
 0x263   :  { %736 = vst.msk [vmem:[#allocation3 + $0xf] sm:$0x1] %vm570_vm2, %v735_v28 }
 0x264   :  { %741 = vst.msk [vmem:[#allocation6] sm:$0xff] %vm123_vm3, %v739_v30 }
 0x265   :  { %752 = vst.msk [vmem:[#allocation6] sm:$0xff] %vm751_vm6, %v746_v31 }
 0x26a   :  { %v740_v51 = vld [vmem:[#allocation3 + $0x8] sm:$0xff] }
 0x26b   :  { %742 = vst.msk [vmem:[#allocation6 + $0x8] sm:$0xff] %vm123_vm3, %v740_v51 }
 0x26c   :  { %753 = vst.msk [vmem:[#allocation6 + $0x8] sm:$0xff] %vm751_vm6, %v748_v32 }
 0x26d   :  { %766 = dma.vmem_to_hbm [thread:$0]  %s759_s16, 256, %s761_s3, [#allocation7], %s896_s5, %s896_s5, %s897_s20  }
 0x26e   :  { %883 = dma.done.wait [#allocation7], 256  }
 0x26f   :  { %884 = vsyncadd [#allocation7], 4294967040 }
 0x270   :  { %771 = vsyncpa [#allocation7], 1 }

</bundles_post_ra>
